<compile_context>
chip_gen: v7x
topology: tpu7x:2x2x1
jax: 0.10.0
libtpu: 0.0.40
codegen_flags: <defaults>
</compile_context>

<pallas_src>
import functools

import numpy as np
import jax
import jax.numpy as jnp
from jax.experimental import pallas as pl
from jax.experimental.pallas import tpu as pltpu


_SUBLANE = 8
_MIN_LANE = 128
_NEG_INF = -1e30            # softmax pad-lane bias; exp() underflows to exactly 0
_MM_DTYPE = jnp.bfloat16    # MXU operand dtype (bf16-native on v5e/v6e/v7x)


def _round_up(x, m):
    return -(-x // m) * m


# ----------------------------------------------------------------------------
# Deterministic parameter initialization (synthetic weights, no checkpoint).
# ----------------------------------------------------------------------------
def _init_mlp(key, sizes, scale=0.1):
    """Shared MLP params: list of (W: (din, dout), b: (1, dout))."""
    params = []
    for din, dout in zip(sizes[:-1], sizes[1:]):
        key, wk, bk = jax.random.split(key, 3)
        W = jax.random.normal(wk, (din, dout), jnp.float32) * scale
        b = jax.random.normal(bk, (1, dout), jnp.float32) * scale
        params.append((W, b))
    return params


def _init_client_mlp(key, num_clients, sizes, scale=0.1):
    """Per-client MLP params stacked on a leading client dim:
    list of (W: (C, din, dout), b: (C, 1, dout))."""
    params = []
    for din, dout in zip(sizes[:-1], sizes[1:]):
        key, wk, bk = jax.random.split(key, 3)
        W = jax.random.normal(wk, (num_clients, din, dout), jnp.float32) * scale
        b = jax.random.normal(bk, (num_clients, 1, dout), jnp.float32) * scale
        params.append((W, b))
    return params


# ----------------------------------------------------------------------------
# Head fusion: several MLPs that consume the SAME input become one MLP whose
# first matmul column-concatenates the heads and whose deeper matmuls are
# block-diagonal (heads stay independent through the shared ReLU).  The last
# stage scatters each head's output to a caller-chosen column offset.
# ----------------------------------------------------------------------------
def _fuse_heads(heads, first_in_rows, out_offsets, out_total, last_bias_fill):
    depth = len(heads[0])
    assert all(len(h) == depth for h in heads), "heads must share depth"
    stages = []
    cur_offs = None
    cur_width = first_in_rows
    for s in range(depth):
        douts = [int(h[s][0].shape[1]) for h in heads]
        if s == depth - 1:
            new_offs = list(out_offsets)
            new_width = out_total
            b = np.asarray(last_bias_fill, np.float32).reshape(1, -1).copy()
        else:
            new_offs = list(np.cumsum([0] + douts[:-1]))
            new_width = _round_up(sum(douts), _MIN_LANE)
            b = np.zeros((1, new_width), np.float32)
        Wf = np.zeros((cur_width, new_width), np.float32)
        for h_i, head in enumerate(heads):
            Wh, bh = head[s]
            Wh = np.asarray(Wh, np.float32)
            din, dout = Wh.shape
            r0 = 0 if s == 0 else int(cur_offs[h_i])
            c0 = int(new_offs[h_i])
            Wf[r0:r0 + din, c0:c0 + dout] = Wh
            b[0, c0:c0 + dout] = np.asarray(bh, np.float32).reshape(-1)
        stages.append((Wf, b))
        cur_offs, cur_width = new_offs, new_width
    return stages


# ----------------------------------------------------------------------------
# Slab packer: all weight matrices (col widths already multiples of 128) plus
# one densely packed bias-row block -> a single lane-padded 2-D slab.
# ----------------------------------------------------------------------------
class _Packer:
    def __init__(self):
        self.wmats = []
        self.bvecs = []

    def weight(self, mat):
        self.wmats.append(np.asarray(mat, np.float32))
        return ("w", len(self.wmats) - 1)

    def bias(self, vec):
        self.bvecs.append(np.asarray(vec, np.float32).reshape(-1))
        return ("b", len(self.bvecs) - 1)

    def finalize(self):
        widths = [m.shape[1] for m in self.wmats] + [v.shape[0] for v in self.bvecs]
        lane = _round_up(max(widths), _MIN_LANE)
        offs, row = [], 0
        for m in self.wmats:
            offs.append(row)
            row += _round_up(m.shape[0], _SUBLANE)
        bias_base = row
        row += _round_up(max(len(self.bvecs), 1), _SUBLANE)
        slab = np.zeros((row, lane), np.float32)
        for m, off in zip(self.wmats, offs):
            slab[off:off + m.shape[0], :m.shape[1]] = m
        for i, v in enumerate(self.bvecs):
            slab[bias_base + i, :v.shape[0]] = v

        def resolve(handle):
            kind, idx = handle
            if kind == "w":
                m = self.wmats[idx]
                return (offs[idx], int(m.shape[0]), int(m.shape[1]))
            v = self.bvecs[idx]
            return (bias_base + idx, 1, int(v.shape[0]))

        return slab, resolve


def _resolve_tree(tree, fn):
    if isinstance(tree, tuple) and len(tree) == 2 and isinstance(tree[0], str):
        return fn(tree)
    if isinstance(tree, (tuple, list)):
        return tuple(_resolve_tree(t, fn) for t in tree)
    return tree


# ----------------------------------------------------------------------------
# Fused Pallas kernel: the entire boosting forward for one batch tile.
# ----------------------------------------------------------------------------
def _make_kernel(*, L, in_size, xlane, cli_lane, co_lane,
                 att_stacks, prd_stacks, m_spec, e_spec, s_spec):

    def read(slab_ref, spec):
        off, r, c = spec
        return slab_ref[pl.ds(off, r), pl.ds(0, c)]          # lane-dense (c % 128 == 0)

    def dense(h, slab_ref, wspec, bspec):
        W = read(slab_ref, wspec)                            # bf16 weights
        b = read(slab_ref, bspec)
        y = jnp.dot(h.astype(W.dtype), W, preferred_element_type=jnp.float32)
        return y + b.astype(jnp.float32)

    def mlp(h, slab_ref, stages):
        n = len(stages)
        for i, (ws, bs) in enumerate(stages):
            h = dense(h, slab_ref, ws, bs)
            if i < n - 1:
                h = jnp.maximum(h, 0.0)                      # ReLU (f32, VPU)
        return h

    def kernel(x_ref, slab_ref, o_ref):
        x = x_ref[...].astype(jnp.float32)                   # (tb, in_size)
        tb = x.shape[0]
        if xlane > in_size:
            orig = jnp.concatenate(
                [x, jnp.zeros((tb, xlane - in_size), jnp.float32)], axis=-1)
        else:
            orig = x
        # Invariant: pad lanes of `orig` (and of `pred`, via the S gather) are
        # exactly 0, so gate=0.5 on pad lanes never leaks into the next layer.

        # ---- fused imp/cli stacks over ALL layers (only consume `orig`) -----
        att_parts = [mlp(orig, slab_ref, stack) for stack in att_stacks]
        att = att_parts[0] if len(att_parts) == 1 else jnp.concatenate(att_parts, -1)
        # layout: [gate_0 (xlane) | ... | gate_{L-1} (xlane) | cli_all (cli_lane)]

        # ---- client-importance softmax, lane-dense over the cli block -------
        cli = att[:, L * xlane:L * xlane + cli_lane]
        cli = cli - jnp.max(cli, axis=-1, keepdims=True)     # pad lanes stay ~-1e30
        ex = jnp.exp(cli)                                    # pad lanes -> exactly 0
        M = read(slab_ref, m_spec)                           # per-layer segment sum
        seg = jnp.dot(ex.astype(M.dtype), M, preferred_element_type=jnp.float32)
        w = ex / jnp.maximum(seg, 1e-30)                     # exact per-segment softmax
        E = read(slab_ref, e_spec)                           # broadcast weights over out
        w_rep = jnp.dot(w.astype(E.dtype), E, preferred_element_type=jnp.float32)
        S = read(slab_ref, s_spec)                           # weighted client-sum gather

        # ---- serial boosting chain: only pred-dependent work remains --------
        x_in = orig
        pred = None
        for l in range(L):
            g = att[:, l * xlane:(l + 1) * xlane]
            gate = 0.5 * (jnp.tanh(0.5 * g) + 1.0)           # sigmoid via one EUP op
            xg = x_in * gate
            h = mlp(xg, slab_ref, prd_stacks[l])             # fused per-client MLPs
            hw = h * w_rep[:, l * co_lane:(l + 1) * co_lane]
            contrib = jnp.dot(hw.astype(S.dtype), S,
                              preferred_element_type=jnp.float32)   # (tb, xlane)
            pred = contrib if pred is None else pred + contrib
            x_in = pred
        o_ref[...] = pred                                    # lane-dense f32 store

    return kernel


def _fused_forward(x, slab, *, kernel, in_size, out_size, xlane,
                   flops_per_row, trans_per_row):
    B = x.shape[0]
    tb = min(256, _round_up(B, _SUBLANE))                    # batch tile (mult of 8)
    b_pad = _round_up(B, tb)
    xp = x.astype(jnp.float32)
    if b_pad != B:
        xp = jnp.pad(xp, ((0, b_pad - B), (0, 0)))
    nb = b_pad // tb
    slab_bytes = int(np.prod(slab.shape)) * slab.dtype.itemsize
    cost = pl.CostEstimate(
        flops=int(b_pad * flops_per_row),
        transcendentals=int(b_pad * trans_per_row),
        bytes_accessed=int(b_pad * in_size * 4 + b_pad * xlane * 4 + slab_bytes))
    out = pl.pallas_call(
        kernel,
        out_shape=jax.ShapeDtypeStruct((b_pad, xlane), jnp.float32),
        grid=(nb,),
        in_specs=[pl.BlockSpec((tb, in_size), lambda i: (i, 0)),
                  pl.BlockSpec(slab.shape, lambda i: (0, 0))],   # slab stays resident
        out_specs=pl.BlockSpec((tb, xlane), lambda i: (i, 0)),
        compiler_params=pltpu.CompilerParams(
            dimension_semantics=("parallel",)),                  # 2x on v7x megacore
        cost_estimate=cost,
    )(xp, slab)
    return out[:B, :out_size]


# ----------------------------------------------------------------------------
# SmartAttentionBoosting (forward only; federation ops are out of scope).
# ----------------------------------------------------------------------------
class SmartAttentionBoostingJAX:
    def __init__(self, input_size, output_size, num_clients,
                 prediction_network_architecture,
                 input_importance_network_architecture,
                 client_importance_network_architecture,
                 seed=0):
        self.input_size = input_size
        self.output_size = output_size
        self.num_clients = num_clients
        self.pred_arch = list(prediction_network_architecture)
        self.imp_arch = list(input_importance_network_architecture)
        self.cli_arch = list(client_importance_network_architecture)
        self._key = jax.random.PRNGKey(seed)
        self.boosting_layers = []
        self._cached = None

    def add_new_boosting_layer(self):
        in_size = self.output_size if self.boosting_layers else self.input_size
        self._key, k_imp, k_cli, k_prd = jax.random.split(self._key, 4)
        imp = _init_mlp(k_imp, [self.input_size] + self.imp_arch + [in_size])
        cli = _init_mlp(k_cli, [self.input_size] + self.cli_arch + [self.num_clients])
        prd = _init_client_mlp(k_prd, self.num_clients,
                               [in_size] + self.pred_arch + [self.output_size])
        self.boosting_layers.append((imp, cli, prd))
        self._cached = None

    # ------------------------------------------------------------------ build
    def _build(self):
        if self._cached is not None:
            return
        C = self.num_clients
        out = self.output_size
        in0 = self.input_size
        L = len(self.boosting_layers)

        xlane = _round_up(max(in0, out), _MIN_LANE)       # gate / pred lane width
        co_lane = _round_up(C * out, _MIN_LANE)           # per-client-output width
        cli_lane = _round_up(L * C, _MIN_LANE)            # combined cli-logit block

        pk = _Packer()

        def pack_stages(stages):
            return tuple((pk.weight(W), pk.bias(b)) for (W, b) in stages)

        # ----- fused imp/cli stacks across ALL layers (consume only orig) ----
        def as_np(params):
            return [(np.asarray(W), np.asarray(b)) for (W, b) in params]

        imp_heads = [as_np(imp) for (imp, _, _) in self.boosting_layers]
        cli_heads = [as_np(cli) for (_, cli, _) in self.boosting_layers]
        gate_offs = [l * xlane for l in range(L)]
        att_total = L * xlane + cli_lane
        if len(self.imp_arch) == len(self.cli_arch):
            cli_offs = [L * xlane + l * C for l in range(L)]
            fill = np.zeros((att_total,), np.float32)
            fill[L * xlane + L * C:] = _NEG_INF           # softmax pad lanes
            stacks = [_fuse_heads(imp_heads + cli_heads, xlane,
                                  gate_offs + cli_offs, att_total, fill)]
        else:
            # different depths -> two fused stacks, concatenated in-kernel
            fill_g = np.zeros((L * xlane,), np.float32)
            fill_c = np.zeros((cli_lane,), np.float32)
            fill_c[L * C:] = _NEG_INF
            stacks = [_fuse_heads(imp_heads, xlane, gate_offs, L * xlane, fill_g),
                      _fuse_heads(cli_heads, xlane,
                                  [l * C for l in range(L)], cli_lane, fill_c)]
        att_stacks = tuple(pack_stages(st) for st in stacks)

        # ----- per-layer fused per-client prediction MLPs ---------------------
        # TODO(synk): the block-diagonal deep-layer packing grows as (C*H)^2;
        #             for large C*H stream per-layer blocks over an 'arbitrary'
        #             grid axis (v7x VMEM is the first to run out).
        prd_stacks = []
        for (_, _, prd) in self.boosting_layers:
            heads = [[(np.asarray(W)[c], np.asarray(b)[c]) for (W, b) in prd]
                     for c in range(C)]
            st = _fuse_heads(heads, xlane, [c * out for c in range(C)],
                             co_lane, np.zeros((co_lane,), np.float32))
            prd_stacks.append(pack_stages(st))
        prd_stacks = tuple(prd_stacks)

        # ----- selector matrices: segment-sum M, broadcast E, gather S --------
        M = np.zeros((cli_lane, cli_lane), np.float32)
        E = np.zeros((cli_lane, L * co_lane), np.float32)
        S = np.zeros((co_lane, xlane), np.float32)
        for l in range(L):
            M[l * C:(l + 1) * C, l * C:(l + 1) * C] = 1.0
            for c in range(C):
                E[l * C + c, l * co_lane + c * out:l * co_lane + (c + 1) * out] = 1.0
        for c in range(C):
            S[c * out:(c + 1) * out, :out] = np.eye(out, dtype=np.float32)
        m_spec, e_spec, s_spec = pk.weight(M), pk.weight(E), pk.weight(S)

        slab_np, resolve = pk.finalize()
        flops_per_row = 2 * sum(int(m.shape[0]) * int(m.shape[1]) for m in pk.wmats)
        trans_per_row = L * xlane + cli_lane

        kernel = _make_kernel(
            L=L, in_size=in0, xlane=xlane, cli_lane=cli_lane, co_lane=co_lane,
            att_stacks=_resolve_tree(att_stacks, resolve),
            prd_stacks=_resolve_tree(prd_stacks, resolve),
            m_spec=resolve(m_spec), e_spec=resolve(e_spec), s_spec=resolve(s_spec))

        slab = jnp.asarray(slab_np, dtype=_MM_DTYPE)      # bf16 MXU operands
        fwd = jax.jit(functools.partial(
            _fused_forward, kernel=kernel, in_size=in0, out_size=out,
            xlane=xlane, flops_per_row=flops_per_row, trans_per_row=trans_per_row))
        self._cached = (slab, fwd)

    # ---------------------------------------------------------------- forward
    def forward(self, x):
        if not self.boosting_layers:
            raise ValueError("No layer created yet.")
        self._build()
        slab, fwd = self._cached
        return fwd(x, slab)

    # Pure-jnp f32 reference (per-client loops, unpacked params) for validation.
    def forward_reference(self, x):
        def mlp(h, params):
            for i, (W, b) in enumerate(params):
                h = h @ W + b
                if i < len(params) - 1:
                    h = jnp.maximum(h, 0.0)
            return h

        def layer(x_in, orig, params):
            imp, cli, prd = params
            gate = jax.nn.sigmoid(mlp(orig, imp))
            xg = x_in * gate
            w = jax.nn.softmax(mlp(orig, cli), axis=-1)
            acc = jnp.zeros((x_in.shape[0], self.output_size), jnp.float32)
            for c in range(self.num_clients):
                hc = xg
                for i, (W, b) in enumerate(prd):
                    hc = hc @ W[c] + b[c]
                    if i < len(prd) - 1:
                        hc = jnp.maximum(hc, 0.0)
                acc = acc + w[:, c:c + 1] * hc
            return acc

        orig = x
        pred = layer(orig, orig, self.boosting_layers[0])
        for params in self.boosting_layers[1:]:
            pred = pred + layer(pred, orig, params)
        return pred


# ----------------------------------------------------------------------------
if __name__ == "__main__":
    INPUT_SIZE = 32
    OUTPUT_SIZE = 16
    NUM_CLIENTS = 4
    BATCH = 8

    model = SmartAttentionBoostingJAX(
        input_size=INPUT_SIZE,
        output_size=OUTPUT_SIZE,
        num_clients=NUM_CLIENTS,
        prediction_network_architecture=[32],
        input_importance_network_architecture=[16],
        client_importance_network_architecture=[16],
        seed=0,
    )
    model.add_new_boosting_layer()   # layer 0: input_size  -> output_size
    model.add_new_boosting_layer()   # layer 1: output_size -> output_size
    model.add_new_boosting_layer()   # layer 2: output_size -> output_size

    key = jax.random.PRNGKey(0)
    x = jax.random.normal(key, (BATCH, INPUT_SIZE), jnp.float32)

    out = jax.block_until_ready(model.forward(x))
    assert out.shape == (BATCH, OUTPUT_SIZE) and out.dtype == jnp.float32

    ref = jax.block_until_ready(model.forward_reference(x))
    # Tolerance absorbs bf16 MXU operands vs. the pure-f32 reference.
    assert bool(jnp.allclose(out, ref, rtol=5e-2, atol=5e-3)), \
        "fused Pallas kernel diverges from reference"

    print("KERNEL_OK")
</pallas_src>

<mosaic_0001>
module attributes {stable_mosaic.version = 11 : i64} {
  func.func @kernel(%arg0: i32, %arg1: memref<8x32xf32, #tpu.memory_space<vmem>>, %arg2: memref<1416x512xbf16, #tpu.memory_space<vmem>>, %arg3: memref<8x128xf32, #tpu.memory_space<vmem>>) attributes {dimension_semantics = [#tpu.dimension_semantics<parallel>], iteration_bounds = array<i64: 1>, scalar_prefetch = 0 : i64, scratch_operands = 0 : i64, tpu.core_type = #tpu.core_type<tc>, window_params = [{transform_indices = @transform_0, window_bounds = array<i64: 8, 32>}, {pipeline_mode = #tpu.pipeline_mode<synchronous>, transform_indices = @transform_1, window_bounds = array<i64: 1416, 512>}, {transform_indices = @transform_2, window_bounds = array<i64: 8, 128>}]} {
    %c0 = arith.constant 0 : index
    %c0_0 = arith.constant 0 : index
    %0 = vector.load %arg1[%c0, %c0_0] : memref<8x32xf32, #tpu.memory_space<vmem>>, vector<8x32xf32>
    %cst = arith.constant 0.000000e+00 : f32
    %1 = vector.broadcast %cst : f32 to vector<8x96xf32>
    %2 = tpu.concatenate %0, %1 in 1 : vector<8x32xf32>, vector<8x96xf32> -> vector<8x128xf32>
    %c0_1 = arith.constant 0 : index
    %c0_2 = arith.constant 0 : index
    %3 = vector.load %arg2[%c0_1, %c0_2] : memref<1416x512xbf16, #tpu.memory_space<vmem>>, vector<128x128xbf16>
    %c1408 = arith.constant 1408 : index
    %c0_3 = arith.constant 0 : index
    %4 = vector.load %arg2[%c1408, %c0_3] : memref<1416x512xbf16, #tpu.memory_space<vmem>>, vector<1x128xbf16>
    %5 = arith.truncf %2 : vector<8x128xf32> to vector<8x128xbf16>
    %cst_4 = arith.constant dense<0.000000e+00> : vector<8x128xf32>
    %6 = tpu.matmul %5, %3, %cst_4 {dimension_numbers = #tpu.dot_dimension_numbers<[1], [0], [0], [1], [0, 0, 1, 1], [], []>} : vector<8x128xbf16>, vector<128x128xbf16>, vector<8x128xf32> -> vector<8x128xf32>
    %7 = arith.extf %4 : vector<1x128xbf16> to vector<1x128xf32>
    %8 = vector.broadcast %7 : vector<1x128xf32> to vector<8x128xf32>
    %9 = arith.addf %6, %8 : vector<8x128xf32>
    %cst_5 = arith.constant 0.000000e+00 : f32
    %10 = vector.broadcast %cst_5 : f32 to vector<8x128xf32>
    %11 = arith.maximumf %9, %10 : vector<8x128xf32>
    %c128 = arith.constant 128 : index
    %c0_6 = arith.constant 0 : index
    %12 = vector.load %arg2[%c128, %c0_6] : memref<1416x512xbf16, #tpu.memory_space<vmem>>, vector<128x512xbf16>
    %c1409 = arith.constant 1409 : index
    %c0_7 = arith.constant 0 : index
    %13 = vector.load %arg2[%c1409, %c0_7] : memref<1416x512xbf16, #tpu.memory_space<vmem>>, vector<1x512xbf16>
    %14 = arith.truncf %11 : vector<8x128xf32> to vector<8x128xbf16>
    %cst_8 = arith.constant dense<0.000000e+00> : vector<8x512xf32>
    %15 = tpu.matmul %14, %12, %cst_8 {dimension_numbers = #tpu.dot_dimension_numbers<[1], [0], [0], [1], [0, 0, 1, 1], [], []>} : vector<8x128xbf16>, vector<128x512xbf16>, vector<8x512xf32> -> vector<8x512xf32>
    %16 = arith.extf %13 : vector<1x512xbf16> to vector<1x512xf32>
    %17 = vector.broadcast %16 : vector<1x512xf32> to vector<8x512xf32>
    %18 = arith.addf %15, %17 : vector<8x512xf32>
    %19 = vector.extract_strided_slice %18 {offsets = [0, 384], sizes = [8, 128], strides = [1, 1]} : vector<8x512xf32> to vector<8x128xf32>
    %cst_9 = arith.constant dense<0xFF800000> : vector<8xf32>
    %20 = vector.multi_reduction <maximumf>, %19, %cst_9 [1] : vector<8x128xf32> to vector<8xf32>
    %21 = vector.shape_cast %20 : vector<8xf32> to vector<8x1xf32>
    %22 = vector.broadcast %21 : vector<8x1xf32> to vector<8x128xf32>
    %23 = arith.subf %19, %22 : vector<8x128xf32>
    %24 = math.exp %23 : vector<8x128xf32>
    %c1024 = arith.constant 1024 : index
    %c0_10 = arith.constant 0 : index
    %25 = vector.load %arg2[%c1024, %c0_10] : memref<1416x512xbf16, #tpu.memory_space<vmem>>, vector<128x128xbf16>
    %26 = arith.truncf %24 : vector<8x128xf32> to vector<8x128xbf16>
    %cst_11 = arith.constant dense<0.000000e+00> : vector<8x128xf32>
    %27 = tpu.matmul %26, %25, %cst_11 {dimension_numbers = #tpu.dot_dimension_numbers<[1], [0], [0], [1], [0, 0, 1, 1], [], []>} : vector<8x128xbf16>, vector<128x128xbf16>, vector<8x128xf32> -> vector<8x128xf32>
    %cst_12 = arith.constant 1.000000e-30 : f32
    %28 = vector.broadcast %cst_12 : f32 to vector<8x128xf32>
    %29 = arith.maximumf %27, %28 : vector<8x128xf32>
    %30 = arith.divf %24, %29 : vector<8x128xf32>
    %c1152 = arith.constant 1152 : index
    %c0_13 = arith.constant 0 : index
    %31 = vector.load %arg2[%c1152, %c0_13] : memref<1416x512xbf16, #tpu.memory_space<vmem>>, vector<128x384xbf16>
    %32 = arith.truncf %30 : vector<8x128xf32> to vector<8x128xbf16>
    %cst_14 = arith.constant dense<0.000000e+00> : vector<8x384xf32>
    %33 = tpu.matmul %32, %31, %cst_14 {dimension_numbers = #tpu.dot_dimension_numbers<[1], [0], [0], [1], [0, 0, 1, 1], [], []>} : vector<8x128xbf16>, vector<128x384xbf16>, vector<8x384xf32> -> vector<8x384xf32>
    %c1280 = arith.constant 1280 : index
    %c0_15 = arith.constant 0 : index
    %34 = vector.load %arg2[%c1280, %c0_15] : memref<1416x512xbf16, #tpu.memory_space<vmem>>, vector<128x128xbf16>
    %35 = vector.extract_strided_slice %18 {offsets = [0, 0], sizes = [8, 128], strides = [1, 1]} : vector<8x512xf32> to vector<8x128xf32>
    %cst_16 = arith.constant 5.000000e-01 : f32
    %36 = vector.broadcast %cst_16 : f32 to vector<8x128xf32>
    %37 = arith.mulf %36, %35 : vector<8x128xf32>
    %38 = math.tanh %37 : vector<8x128xf32>
    %cst_17 = arith.constant 1.000000e+00 : f32
    %39 = vector.broadcast %cst_17 : f32 to vector<8x128xf32>
    %40 = arith.addf %38, %39 : vector<8x128xf32>
    %cst_18 = arith.constant 5.000000e-01 : f32
    %41 = vector.broadcast %cst_18 : f32 to vector<8x128xf32>
    %42 = arith.mulf %41, %40 : vector<8x128xf32>
    %43 = arith.mulf %2, %42 : vector<8x128xf32>
    %c256 = arith.constant 256 : index
    %c0_19 = arith.constant 0 : index
    %44 = vector.load %arg2[%c256, %c0_19] : memref<1416x512xbf16, #tpu.memory_space<vmem>>, vector<128x128xbf16>
    %c1410 = arith.constant 1410 : index
    %c0_20 = arith.constant 0 : index
    %45 = vector.load %arg2[%c1410, %c0_20] : memref<1416x512xbf16, #tpu.memory_space<vmem>>, vector<1x128xbf16>
    %46 = arith.truncf %43 : vector<8x128xf32> to vector<8x128xbf16>
    %cst_21 = arith.constant dense<0.000000e+00> : vector<8x128xf32>
    %47 = tpu.matmul %46, %44, %cst_21 {dimension_numbers = #tpu.dot_dimension_numbers<[1], [0], [0], [1], [0, 0, 1, 1], [], []>} : vector<8x128xbf16>, vector<128x128xbf16>, vector<8x128xf32> -> vector<8x128xf32>
    %48 = arith.extf %45 : vector<1x128xbf16> to vector<1x128xf32>
    %49 = vector.broadcast %48 : vector<1x128xf32> to vector<8x128xf32>
    %50 = arith.addf %47, %49 : vector<8x128xf32>
    %cst_22 = arith.constant 0.000000e+00 : f32
    %51 = vector.broadcast %cst_22 : f32 to vector<8x128xf32>
    %52 = arith.maximumf %50, %51 : vector<8x128xf32>
    %c384 = arith.constant 384 : index
    %c0_23 = arith.constant 0 : index
    %53 = vector.load %arg2[%c384, %c0_23] : memref<1416x512xbf16, #tpu.memory_space<vmem>>, vector<128x128xbf16>
    %c1411 = arith.constant 1411 : index
    %c0_24 = arith.constant 0 : index
    %54 = vector.load %arg2[%c1411, %c0_24] : memref<1416x512xbf16, #tpu.memory_space<vmem>>, vector<1x128xbf16>
    %55 = arith.truncf %52 : vector<8x128xf32> to vector<8x128xbf16>
    %cst_25 = arith.constant dense<0.000000e+00> : vector<8x128xf32>
    %56 = tpu.matmul %55, %53, %cst_25 {dimension_numbers = #tpu.dot_dimension_numbers<[1], [0], [0], [1], [0, 0, 1, 1], [], []>} : vector<8x128xbf16>, vector<128x128xbf16>, vector<8x128xf32> -> vector<8x128xf32>
    %57 = arith.extf %54 : vector<1x128xbf16> to vector<1x128xf32>
    %58 = vector.broadcast %57 : vector<1x128xf32> to vector<8x128xf32>
    %59 = arith.addf %56, %58 : vector<8x128xf32>
    %60 = vector.extract_strided_slice %33 {offsets = [0, 0], sizes = [8, 128], strides = [1, 1]} : vector<8x384xf32> to vector<8x128xf32>
    %61 = arith.mulf %59, %60 : vector<8x128xf32>
    %62 = arith.truncf %61 : vector<8x128xf32> to vector<8x128xbf16>
    %cst_26 = arith.constant dense<0.000000e+00> : vector<8x128xf32>
    %63 = tpu.matmul %62, %34, %cst_26 {dimension_numbers = #tpu.dot_dimension_numbers<[1], [0], [0], [1], [0, 0, 1, 1], [], []>} : vector<8x128xbf16>, vector<128x128xbf16>, vector<8x128xf32> -> vector<8x128xf32>
    %64 = vector.extract_strided_slice %18 {offsets = [0, 128], sizes = [8, 128], strides = [1, 1]} : vector<8x512xf32> to vector<8x128xf32>
    %cst_27 = arith.constant 5.000000e-01 : f32
    %65 = vector.broadcast %cst_27 : f32 to vector<8x128xf32>
    %66 = arith.mulf %65, %64 : vector<8x128xf32>
    %67 = math.tanh %66 : vector<8x128xf32>
    %cst_28 = arith.constant 1.000000e+00 : f32
    %68 = vector.broadcast %cst_28 : f32 to vector<8x128xf32>
    %69 = arith.addf %67, %68 : vector<8x128xf32>
    %cst_29 = arith.constant 5.000000e-01 : f32
    %70 = vector.broadcast %cst_29 : f32 to vector<8x128xf32>
    %71 = arith.mulf %70, %69 : vector<8x128xf32>
    %72 = arith.mulf %63, %71 : vector<8x128xf32>
    %c512 = arith.constant 512 : index
    %c0_30 = arith.constant 0 : index
    %73 = vector.load %arg2[%c512, %c0_30] : memref<1416x512xbf16, #tpu.memory_space<vmem>>, vector<128x128xbf16>
    %c1412 = arith.constant 1412 : index
    %c0_31 = arith.constant 0 : index
    %74 = vector.load %arg2[%c1412, %c0_31] : memref<1416x512xbf16, #tpu.memory_space<vmem>>, vector<1x128xbf16>
    %75 = arith.truncf %72 : vector<8x128xf32> to vector<8x128xbf16>
    %cst_32 = arith.constant dense<0.000000e+00> : vector<8x128xf32>
    %76 = tpu.matmul %75, %73, %cst_32 {dimension_numbers = #tpu.dot_dimension_numbers<[1], [0], [0], [1], [0, 0, 1, 1], [], []>} : vector<8x128xbf16>, vector<128x128xbf16>, vector<8x128xf32> -> vector<8x128xf32>
    %77 = arith.extf %74 : vector<1x128xbf16> to vector<1x128xf32>
    %78 = vector.broadcast %77 : vector<1x128xf32> to vector<8x128xf32>
    %79 = arith.addf %76, %78 : vector<8x128xf32>
    %cst_33 = arith.constant 0.000000e+00 : f32
    %80 = vector.broadcast %cst_33 : f32 to vector<8x128xf32>
    %81 = arith.maximumf %79, %80 : vector<8x128xf32>
    %c640 = arith.constant 640 : index
    %c0_34 = arith.constant 0 : index
    %82 = vector.load %arg2[%c640, %c0_34] : memref<1416x512xbf16, #tpu.memory_space<vmem>>, vector<128x128xbf16>
    %c1413 = arith.constant 1413 : index
    %c0_35 = arith.constant 0 : index
    %83 = vector.load %arg2[%c1413, %c0_35] : memref<1416x512xbf16, #tpu.memory_space<vmem>>, vector<1x128xbf16>
    %84 = arith.truncf %81 : vector<8x128xf32> to vector<8x128xbf16>
    %cst_36 = arith.constant dense<0.000000e+00> : vector<8x128xf32>
    %85 = tpu.matmul %84, %82, %cst_36 {dimension_numbers = #tpu.dot_dimension_numbers<[1], [0], [0], [1], [0, 0, 1, 1], [], []>} : vector<8x128xbf16>, vector<128x128xbf16>, vector<8x128xf32> -> vector<8x128xf32>
    %86 = arith.extf %83 : vector<1x128xbf16> to vector<1x128xf32>
    %87 = vector.broadcast %86 : vector<1x128xf32> to vector<8x128xf32>
    %88 = arith.addf %85, %87 : vector<8x128xf32>
    %89 = vector.extract_strided_slice %33 {offsets = [0, 128], sizes = [8, 128], strides = [1, 1]} : vector<8x384xf32> to vector<8x128xf32>
    %90 = arith.mulf %88, %89 : vector<8x128xf32>
    %91 = arith.truncf %90 : vector<8x128xf32> to vector<8x128xbf16>
    %cst_37 = arith.constant dense<0.000000e+00> : vector<8x128xf32>
    %92 = tpu.matmul %91, %34, %cst_37 {dimension_numbers = #tpu.dot_dimension_numbers<[1], [0], [0], [1], [0, 0, 1, 1], [], []>} : vector<8x128xbf16>, vector<128x128xbf16>, vector<8x128xf32> -> vector<8x128xf32>
    %93 = arith.addf %63, %92 : vector<8x128xf32>
    %94 = vector.extract_strided_slice %18 {offsets = [0, 256], sizes = [8, 128], strides = [1, 1]} : vector<8x512xf32> to vector<8x128xf32>
    %cst_38 = arith.constant 5.000000e-01 : f32
    %95 = vector.broadcast %cst_38 : f32 to vector<8x128xf32>
    %96 = arith.mulf %95, %94 : vector<8x128xf32>
    %97 = math.tanh %96 : vector<8x128xf32>
    %cst_39 = arith.constant 1.000000e+00 : f32
    %98 = vector.broadcast %cst_39 : f32 to vector<8x128xf32>
    %99 = arith.addf %97, %98 : vector<8x128xf32>
    %cst_40 = arith.constant 5.000000e-01 : f32
    %100 = vector.broadcast %cst_40 : f32 to vector<8x128xf32>
    %101 = arith.mulf %100, %99 : vector<8x128xf32>
    %102 = arith.mulf %93, %101 : vector<8x128xf32>
    %c768 = arith.constant 768 : index
    %c0_41 = arith.constant 0 : index
    %103 = vector.load %arg2[%c768, %c0_41] : memref<1416x512xbf16, #tpu.memory_space<vmem>>, vector<128x128xbf16>
    %c1414 = arith.constant 1414 : index
    %c0_42 = arith.constant 0 : index
    %104 = vector.load %arg2[%c1414, %c0_42] : memref<1416x512xbf16, #tpu.memory_space<vmem>>, vector<1x128xbf16>
    %105 = arith.truncf %102 : vector<8x128xf32> to vector<8x128xbf16>
    %cst_43 = arith.constant dense<0.000000e+00> : vector<8x128xf32>
    %106 = tpu.matmul %105, %103, %cst_43 {dimension_numbers = #tpu.dot_dimension_numbers<[1], [0], [0], [1], [0, 0, 1, 1], [], []>} : vector<8x128xbf16>, vector<128x128xbf16>, vector<8x128xf32> -> vector<8x128xf32>
    %107 = arith.extf %104 : vector<1x128xbf16> to vector<1x128xf32>
    %108 = vector.broadcast %107 : vector<1x128xf32> to vector<8x128xf32>
    %109 = arith.addf %106, %108 : vector<8x128xf32>
    %cst_44 = arith.constant 0.000000e+00 : f32
    %110 = vector.broadcast %cst_44 : f32 to vector<8x128xf32>
    %111 = arith.maximumf %109, %110 : vector<8x128xf32>
    %c896 = arith.constant 896 : index
    %c0_45 = arith.constant 0 : index
    %112 = vector.load %arg2[%c896, %c0_45] : memref<1416x512xbf16, #tpu.memory_space<vmem>>, vector<128x128xbf16>
    %c1415 = arith.constant 1415 : index
    %c0_46 = arith.constant 0 : index
    %113 = vector.load %arg2[%c1415, %c0_46] : memref<1416x512xbf16, #tpu.memory_space<vmem>>, vector<1x128xbf16>
    %114 = arith.truncf %111 : vector<8x128xf32> to vector<8x128xbf16>
    %cst_47 = arith.constant dense<0.000000e+00> : vector<8x128xf32>
    %115 = tpu.matmul %114, %112, %cst_47 {dimension_numbers = #tpu.dot_dimension_numbers<[1], [0], [0], [1], [0, 0, 1, 1], [], []>} : vector<8x128xbf16>, vector<128x128xbf16>, vector<8x128xf32> -> vector<8x128xf32>
    %116 = arith.extf %113 : vector<1x128xbf16> to vector<1x128xf32>
    %117 = vector.broadcast %116 : vector<1x128xf32> to vector<8x128xf32>
    %118 = arith.addf %115, %117 : vector<8x128xf32>
    %119 = vector.extract_strided_slice %33 {offsets = [0, 256], sizes = [8, 128], strides = [1, 1]} : vector<8x384xf32> to vector<8x128xf32>
    %120 = arith.mulf %118, %119 : vector<8x128xf32>
    %121 = arith.truncf %120 : vector<8x128xf32> to vector<8x128xbf16>
    %cst_48 = arith.constant dense<0.000000e+00> : vector<8x128xf32>
    %122 = tpu.matmul %121, %34, %cst_48 {dimension_numbers = #tpu.dot_dimension_numbers<[1], [0], [0], [1], [0, 0, 1, 1], [], []>} : vector<8x128xbf16>, vector<128x128xbf16>, vector<8x128xf32> -> vector<8x128xf32>
    %123 = arith.addf %93, %122 : vector<8x128xf32>
    %c0_49 = arith.constant 0 : index
    %c0_50 = arith.constant 0 : index
    %124 = vector.load %arg3[%c0_49, %c0_50] : memref<8x128xf32, #tpu.memory_space<vmem>>, vector<8x128xf32>
    tpu.vector_store %arg3[%c0_49, %c0_50], %123 {strides = array<i32>} : memref<8x128xf32, #tpu.memory_space<vmem>>, vector<8x128xf32>,
    return
  }
  func.func @transform_0(%arg0: i32) -> (i32, i32) {
    %c0_i32 = arith.constant 0 : i32
    %c0_i32_0 = arith.constant 0 : i32
    return %arg0, %c0_i32 : i32, i32
  }
  func.func @transform_1(%arg0: i32) -> (i32, i32) {
    %c0_i32 = arith.constant 0 : i32
    %c0_i32_0 = arith.constant 0 : i32
    %c0_i32_1 = arith.constant 0 : i32
    return %c0_i32, %c0_i32_0 : i32, i32
  }
  func.func @transform_2(%arg0: i32) -> (i32, i32) {
    %c0_i32 = arith.constant 0 : i32
    %c0_i32_0 = arith.constant 0 : i32
    return %arg0, %c0_i32 : i32, i32
  }
}

</mosaic_0001>

<bundles_post_ra>
// kernel: _fused_forward.1
= control target key start
LH: loop header
LB: loop body
LE: loop exit
PB: predicated region body
PF: predicated region fallthrough
CT: control target
= control target key end

     0   :  { %7 = vsyncpa [#allocation3], 0  ;;  %s2692_s0 = inlined_call_operand.hbm [shape: f32[8,32], index: 0, kind: input, shape index: {}]   ;;  %s2693_s1 = inlined_call_operand.hbm [shape: bf16[1416,512], index: 1, kind: input, shape index: {}]   ;;  %s2694_s2 = inlined_call_operand.hbm [shape: f32[8,128], index: 2, kind: output, shape index: {}]  }
   0x1   :  { %8 = vsyncpa [#allocation6], 0 }
   0x2   :  { %9 = vsyncpa [#allocation4], 0  ;;  %s2414_s9 = smov [#allocation2]   ;;  %s2415_s11 = smov [#allocation5]  }
   0x3   :  { %s16_s10 = sshll.u32 %s2414_s9, 4  ;;  %s25_s12 = sshll.u32 %s2415_s11, 4  ;;  %s17_s10 = int_to_ptr.vmem [resolvable:$true] %s16_s10  ;;  %s2437_s12 = int_to_ptr.vmem [resolvable:$true] %s25_s12 }
   0x4   :  { %s2342_s15 = scalar_lea.hbm %s2692_s0, 128 }
   0x5   :  { %p2343_p0 = scmp.ne.s32.totalorder %s2692_s0, %s2342_s15  ;;  %p2346_p1 = scmp.lt.u32.totalorder %s2342_s15, %s2692_s0 }
   0x7   :  { %p2348_p2 = pnand %p2346_p1, %p2343_p0 }
   0x9   :  { %2351 = shalt.err (!%p2348_p2)
}
   0xa   :  { %s2352_s20 = scalar_lea.vmem %s17_s10, 128  ;;  %p2357_p4 = scmp.lt.s32.totalorder %s17_s10, %s17_s10 }
   0xb   :  { %p2353_p3 = scmp.ne.s32.totalorder %s17_s10, %s2352_s20  ;;  %p2358_p5 = scmp.lt.s32.totalorder %s2352_s20, %s2352_s20 }
   0xd   :  { %p2359_p6 = por %p2358_p5, %p2357_p4 }
   0xf   :  { %p2360_p7 = pnand %p2359_p6, %p2353_p3 }
  0x11   :  { %2363 = shalt.err (!%p2360_p7)
}
  0x12   :  { %19 = dma.hbm_to_vmem [thread:$0]  %s2692_s0, 128, %s17_s10, [#allocation3]  }
  0x13   :  { %s2364_s25 = scalar_lea.hbm %s2693_s1, 45312 }
  0x14   :  { %p2365_p8 = scmp.ne.s32.totalorder %s2693_s1, %s2364_s25  ;;  %p2368_p9 = scmp.lt.u32.totalorder %s2364_s25, %s2693_s1 }
  0x16   :  { %p2370_p10 = pnand %p2368_p9, %p2365_p8 }
  0x18   :  { %2373 = shalt.err (!%p2370_p10)
}
  0x19   :  { %s2374_s30 = scalar_lea.vmem %s2437_s12, 45312  ;;  %p2379_p12 = scmp.lt.s32.totalorder %s2437_s12, %s2437_s12 }
  0x1a   :  { %p2375_p11 = scmp.ne.s32.totalorder %s2437_s12, %s2374_s30  ;;  %p2380_p13 = scmp.lt.s32.totalorder %s2374_s30, %s2374_s30 }
  0x1c   :  { %p2381_p0 = por %p2380_p13, %p2379_p12 }
  0x1e   :  { %p2382_p1 = pnand %p2381_p0, %p2375_p11 }
  0x20   :  { %2385 = shalt.err (!%p2382_p1)
}
  0x21   :  { %s2416_s0 = smov 256   ;;  %s2417_s3 = smov 16  }
  0x22   :  { %31 = dma.hbm_to_vmem [thread:$0]  %s2693_s1, 45312, %s2437_s12, [#allocation6], %s2416_s0, %s2416_s0, %s2417_s3  }
  0x23   :  { %2408 = dma.done.wait [#allocation3], 128  }
  0x24   :  { %2409 = vsyncadd [#allocation3], 4294967168 }
  0x25   :  { %2410 = dma.done.wait [#allocation6], 45312  }
  0x26   :  { %2411 = vsyncadd [#allocation6], 4294921984  ;;  %v2418_v0 = vmov 0.0   ;;  %vm2419_vm0 = vmmov 0   ;;  %v2180_v1 = vld [vmem:[#allocation5] ss:$16 sps:$4 sm:$0xff]   ;;  %v61_v46 = vlaneseq }
  0x27   :  { %1932 = vmatprep.subr.bf16.mxu0 %v2418_v0  ;;  %1948 = vmatprep.mubr.msk.bf16.mxu0 %vm2419_vm0, %v2418_v0  ;;  %v2181_v2 = vld [vmem:[#allocation5 + $0x20] ss:$16 sps:$4 sm:$0xff]   ;;  %v39_v4 = vld [vmem:[#allocation2] sm:$0xff]  ;;  %vm40_vm1 = vcmask 261120   ;;  %v2188_v6 = vld [vmem:[#allocation5 + $0x104] ss:$16 sps:$4 sm:$0xff]  }
  0x28   :  { %1933 = vmatpush3.bf16.msra.mxu0 %v2180_v1  ;;  %v2182_v3 = vld [vmem:[#allocation5 + $0x40] ss:$16 sps:$4 sm:$0xff]   ;;  %v2474_v5 = vsel %vm40_vm1, %v39_v4, 0.0  ;;  %369 = vmatprep.subr.bf16.mxu1 %v2188_v6  ;;  %v2194_v9 = vld [vmem:[#allocation5 + $0x124] ss:$16 sps:$4 sm:$0xff]   ;;  %vm2482_vm2 = vmpackc.low %vm40_vm1, %vm40_vm1  ;;  %v1702_v27 = vpack.c.bf16 %v39_v4, %v39_v4  ;;  %v2420_v45 = vmov 0  }
  0x29   :  { %1934 = vmatprep.subr.bf16.mxu0 %v2418_v0  ;;  %v2183_v7 = vld [vmem:[#allocation5 + $0x60] ss:$16 sps:$4 sm:$0xff]   ;;  %v2200_v12 = vld [vmem:[#allocation5 + $0x144] ss:$16 sps:$4 sm:$0xff]   ;;  %v2192_v23 = vld [vmem:[#allocation5 + $0x10c] ss:$16 sps:$4 sm:$0xff]   ;;  %401 = vmatprep.mubr.bf16.mxu1 %v2420_v45 }
  0x2a   :  { %v2193_v8 = vld [vmem:[#allocation5 + $0x100] ss:$16 sps:$4 sm:$0xff]   ;;  %v2206_v14 = vld [vmem:[#allocation5 + $0x164] ss:$16 sps:$4 sm:$0xff]   ;;  %v2190_v26 = vld [vmem:[#allocation5 + $0x108] ss:$16 sps:$4 sm:$0xff]  }
  0x2b   :  { %370 = vmatpush1.bf16.msra.mxu1 %v2193_v8  ;;  %v2184_v10 = vld [vmem:[#allocation5 + $0x80] ss:$16 sps:$4 sm:$0xff]   ;;  %v2212_v17 = vld [vmem:[#allocation5 + $0x184] ss:$16 sps:$4 sm:$0xff]   ;;  %v2198_v28 = vld [vmem:[#allocation5 + $0x12c] ss:$16 sps:$4 sm:$0xff]  }
  0x2c   :  { %1935 = vmatpush3.bf16.msra.mxu0 %v2181_v2  ;;  %371 = vmatprep.subr.bf16.mxu1 %v2194_v9  ;;  %v2199_v11 = vld [vmem:[#allocation5 + $0x120] ss:$16 sps:$4 sm:$0xff]   ;;  %v2218_v21 = vld [vmem:[#allocation5 + $0x1a4] ss:$16 sps:$4 sm:$0xff]   ;;  %v2196_v29 = vld [vmem:[#allocation5 + $0x128] ss:$16 sps:$4 sm:$0xff]  }
  0x2d   :  { %1936 = vmatprep.subr.bf16.mxu0 %v2418_v0  ;;  %v2205_v13 = vld [vmem:[#allocation5 + $0x140] ss:$16 sps:$4 sm:$0xff]   ;;  %v2224_v25 = vld [vmem:[#allocation5 + $0x1c4] ss:$16 sps:$4 sm:$0xff]   ;;  %v2204_v30 = vld [vmem:[#allocation5 + $0x14c] ss:$16 sps:$4 sm:$0xff]  }
  0x2e   :  { %v2185_v15 = vld [vmem:[#allocation5 + $0xa0] ss:$16 sps:$4 sm:$0xff]   ;;  %v2202_v31 = vld [vmem:[#allocation5 + $0x148] ss:$16 sps:$4 sm:$0xff]   ;;  %v2210_v32 = vld [vmem:[#allocation5 + $0x16c] ss:$16 sps:$4 sm:$0xff]  }
  0x2f   :  { %372 = vmatpush1.bf16.msra.mxu1 %v2199_v11  ;;  %v2211_v16 = vld [vmem:[#allocation5 + $0x160] ss:$16 sps:$4 sm:$0xff]   ;;  %v2208_v33 = vld [vmem:[#allocation5 + $0x168] ss:$16 sps:$4 sm:$0xff]   ;;  %v2216_v34 = vld [vmem:[#allocation5 + $0x18c] ss:$16 sps:$4 sm:$0xff]  }
  0x30   :  { %1937 = vmatpush3.bf16.msra.mxu0 %v2182_v3  ;;  %373 = vmatprep.subr.bf16.mxu1 %v2200_v12  ;;  %v2186_v18 = vld [vmem:[#allocation5 + $0xc0] ss:$16 sps:$4 sm:$0xff]   ;;  %v2214_v35 = vld [vmem:[#allocation5 + $0x188] ss:$16 sps:$4 sm:$0xff]   ;;  %v2222_v36 = vld [vmem:[#allocation5 + $0x1ac] ss:$16 sps:$4 sm:$0xff]  }
  0x31   :  { %1938 = vmatprep.subr.bf16.mxu0 %v2418_v0  ;;  %v2217_v20 = vld [vmem:[#allocation5 + $0x180] ss:$16 sps:$4 sm:$0xff]   ;;  %v2220_v37 = vld [vmem:[#allocation5 + $0x1a8] ss:$16 sps:$4 sm:$0xff]   ;;  %v2228_v38 = vld [vmem:[#allocation5 + $0x1cc] ss:$16 sps:$4 sm:$0xff]  }
  0x32   :  { %v2187_v22 = vld [vmem:[#allocation5 + $0xe0] ss:$16 sps:$4 sm:$0xff]   ;;  %v2226_v39 = vld [vmem:[#allocation5 + $0x1c8] ss:$16 sps:$4 sm:$0xff]   ;;  %v2230_v41 = vld [vmem:[#allocation5 + $0x1e4] ss:$16 sps:$4 sm:$0xff]  }
  0x33   :  { %374 = vmatpush1.bf16.msra.mxu1 %v2205_v13  ;;  %v2223_v24 = vld [vmem:[#allocation5 + $0x1a0] ss:$16 sps:$4 sm:$0xff]   ;;  %v2234_v42 = vld [vmem:[#allocation5 + $0x1ec] ss:$16 sps:$4 sm:$0xff]   ;;  %v2232_v43 = vld [vmem:[#allocation5 + $0x1e8] ss:$16 sps:$4 sm:$0xff]  }
  0x34   :  { %1939 = vmatpush3.bf16.msra.mxu0 %v2183_v7  ;;  %375 = vmatprep.subr.bf16.mxu1 %v2206_v14  ;;  %v2229_v40 = vld [vmem:[#allocation5 + $0x1c0] ss:$16 sps:$4 sm:$0xff]   ;;  %v2490_v47 = vshrl.u32 %v61_v46, 7  ;;  %v187_v1 = vld [vmem:[#allocation5 + $0xb08] sm:$0x11]  ;;  %s2421_s1 = smov [#allocation7]  }
  0x35   :  { %1940 = vmatprep.subr.bf16.mxu0 %v2418_v0  ;;  %v2235_v44 = vld [vmem:[#allocation5 + $0x1e0] ss:$16 sps:$4 sm:$0xff]   ;;  %v191_v4 = vunpack.c.l.bf16 %v187_v1  ;;  %v192_v6 = vunpack.c.h.bf16 %v187_v1  ;;  %v2262_v46 = vld [vmem:[#allocation5 + $0x984] ss:$16 sps:$4 sm:$0xff]   ;;  %s1683_s6 = sshll.u32 %s2421_s1, 4  ;;  %s1684_s6 = int_to_ptr.vmem [resolvable:$true] %s1683_s6 }
  0x36   :  { %v58_v48 = vld [vmem:[#allocation5 + $0xb00] sm:$0x1]  ;;  %v63_v50 = vsub.s32 0, %v2490_v47  ;;  %v2503_v3 = vsub.s32 1, %v2490_v47  ;;  %s2386_s7 = scalar_lea.vmem %s1684_s6, 128  ;;  %p2391_p3 = scmp.lt.s32.totalorder %s1684_s6, %s1684_s6 }
  0x37   :  { %376 = vmatpush1.bf16.msra.mxu1 %v2211_v16  ;;  %v60_v49 = vunpack.c.l.bf16 %v58_v48  ;;  %v2236_v59 = vld [vmem:[#allocation5 + $0x800] ss:$16 sps:$4 sm:$0xff]   ;;  %p2387_p2 = scmp.ne.s32.totalorder %s1684_s6, %s2386_s7  ;;  %p2392_p4 = scmp.lt.s32.totalorder %s2386_s7, %s2386_s7 }
  0x38   :  { %1941 = vmatpush3.bf16.msra.mxu0 %v2184_v10  ;;  %377 = vmatprep.subr.bf16.mxu1 %v2212_v17  ;;  %v2237_v60 = vld [vmem:[#allocation5 + $0x820] ss:$16 sps:$4 sm:$0xff]   ;;  %v204_v8 = vrot.slane %v191_v4, %v2503_v3  ;;  %v208_v9 = vrot.slane %v192_v6, %v2503_v3 }
  0x39   :  { %1942 = vmatprep.subr.bf16.mxu0 %v2418_v0  ;;  %v64_v51 = vrot.slane %v60_v49, %v63_v50  ;;  %v2238_v61 = vld [vmem:[#allocation5 + $0x840] ss:$16 sps:$4 sm:$0xff]   ;;  %v2263_v49 = vld [vmem:[#allocation5 + $0x988] ss:$16 sps:$4 sm:$0xff]   ;;  %p2393_p5 = por %p2392_p4, %p2391_p3 }
  0x3a   :  { %v2239_v62 = vld [vmem:[#allocation5 + $0x860] ss:$16 sps:$4 sm:$0xff]  }
  0x3b   :  { %378 = vmatpush1.bf16.msra.mxu1 %v2217_v20  ;;  %v2499_v63 = vld [vmem:[#allocation5 + $0xb00] sm:$0x11]  ;;  %p2394_p6 = pnand %p2393_p5, %p2387_p2 }
  0x3c   :  { %1943 = vmatpush3.bf16.msra.mxu0 %v2185_v15  ;;  %379 = vmatprep.subr.bf16.mxu1 %v2218_v21  ;;  %v189_v2 = vunpack.c.l.bf16 %v2499_v63  ;;  %v2260_v48 = vld [vmem:[#allocation5 + $0x980] ss:$16 sps:$4 sm:$0xff]  }
  0x3d   :  { %1944 = vmatprep.subr.bf16.mxu0 %v2418_v0  ;;  %v2264_v50 = vld [vmem:[#allocation5 + $0x9a0] ss:$16 sps:$4 sm:$0xff]  }
  0x3e   :  { %v196_v7 = vrot.slane %v189_v2, %v2503_v3  ;;  %v2276_v6 = vld [vmem:[#allocation5 + $0x200] ss:$16 sps:$4 sm:$0xff]  }
  0x3f   :  { %380 = vmatpush1.bf16.msra.mxu1 %v2223_v24 }
  0x40   :  { %1945 = vmatpush3.bf16.msra.mxu0 %v2186_v18  ;;  %381 = vmatprep.subr.bf16.mxu1 %v2224_v25  ;;  %v2240_v25 = vld [vmem:[#allocation5 + $0x880] ss:$16 sps:$4 sm:$0xff]  }
  0x41   :  { %1946 = vmatprep.subr.bf16.mxu0 %v2418_v0 }
  0x43   :  { %382 = vmatpush1.bf16.msra.mxu1 %v2229_v40 }
  0x44   :  { %1947 = vmatpush3.bf16.msra.mxu0 %v2187_v22  ;;  %383 = vmatprep.subr.bf16.mxu1 %v2230_v41  ;;  %v2247_v41 = vld [vmem:[#allocation5 + $0x908] ss:$16 sps:$4 sm:$0xff]  }
  0x45   :  { %410 = vmatprep.subr.bf16.mxu0 %v2192_v23 }
  0x47   :  { %1949 = vmatmul.mubr.msk.bf16.vlgmr.msra.gmra.mrb[0].mxu0 %vm2482_vm2, %v1702_v27  ;;  %384 = vmatpush1.bf16.msra.mxu1 %v2235_v44  ;;  %v2241_v27 = vld [vmem:[#allocation5 + $0x8a0] ss:$16 sps:$4 sm:$0xff]   ;;  %v2255_v44 = vld [vmem:[#allocation5 + $0x948] ss:$16 sps:$4 sm:$0xff]  }
  0x48   :  { %411 = vmatpush1.bf16.msra.mxu0 %v2190_v26  ;;  %1952 = vmatprep.subr.bf16.mxu1 %v2418_v0 }
  0x49   :  { %412 = vmatprep.subr.bf16.mxu0 %v2198_v28  ;;  %442 = vmatprep.mubr.bf16.mxu0 %v2420_v45  ;;  %v2242_v28 = vld [vmem:[#allocation5 + $0x8c0] ss:$16 sps:$4 sm:$0xff]  }
  0x4c   :  { %413 = vmatpush1.bf16.msra.mxu0 %v2196_v29  ;;  %v2243_v29 = vld [vmem:[#allocation5 + $0x8e0] ss:$16 sps:$4 sm:$0xff]  }
  0x4d   :  { %414 = vmatprep.subr.bf16.mxu0 %v2204_v30  ;;  %v2244_v30 = vld [vmem:[#allocation5 + $0x900] ss:$16 sps:$4 sm:$0xff]  }
  0x50   :  { %415 = vmatpush1.bf16.msra.mxu0 %v2202_v31  ;;  %v2246_v31 = vld [vmem:[#allocation5 + $0x904] ss:$16 sps:$4 sm:$0xff]  }
  0x51   :  { %416 = vmatprep.subr.bf16.mxu0 %v2210_v32  ;;  %v2250_v32 = vld [vmem:[#allocation5 + $0x924] ss:$16 sps:$4 sm:$0xff]  }
  0x54   :  { %417 = vmatpush1.bf16.msra.mxu0 %v2208_v33  ;;  %v2254_v33 = vld [vmem:[#allocation5 + $0x944] ss:$16 sps:$4 sm:$0xff]  }
  0x55   :  { %418 = vmatprep.subr.bf16.mxu0 %v2216_v34  ;;  %v2252_v34 = vld [vmem:[#allocation5 + $0x940] ss:$16 sps:$4 sm:$0xff]  }
  0x58   :  { %419 = vmatpush1.bf16.msra.mxu0 %v2214_v35  ;;  %v2258_v35 = vld [vmem:[#allocation5 + $0x964] ss:$16 sps:$4 sm:$0xff]  }
  0x59   :  { %420 = vmatprep.subr.bf16.mxu0 %v2222_v36  ;;  %v2256_v36 = vld [vmem:[#allocation5 + $0x960] ss:$16 sps:$4 sm:$0xff]  }
  0x5c   :  { %421 = vmatpush1.bf16.msra.mxu0 %v2220_v37 }
  0x5d   :  { %422 = vmatprep.subr.bf16.mxu0 %v2228_v38 }
  0x60   :  { %423 = vmatpush1.bf16.msra.mxu0 %v2226_v39 }
  0x61   :  { %424 = vmatprep.subr.bf16.mxu0 %v2234_v42 }
  0x64   :  { %425 = vmatpush1.bf16.msra.mxu0 %v2232_v43  ;;  %v2251_v43 = vld [vmem:[#allocation5 + $0x928] ss:$16 sps:$4 sm:$0xff]  }
  0x65   :  { %725 = vmatprep.subr.bf16.mxu0 %v2246_v31  ;;  %v2573_v31 = vld [vmem:[#allocation5 + $0xaa0] ss:$16 sps:$4 sm:$0xff]  }
 0x11a   :  { %v147_v52 = vpop.f32.mrb[0].mxu0 }
 0x11b   :  { %v148_v53 = vadd.f32 %v147_v52, %v64_v51  ;;  %v1950_v54 = vpop.f32.mrb[1].mxu0  ;;  %v2266_v51 = vld [vmem:[#allocation5 + $0x9a4] ss:$16 sps:$4 sm:$0xff]   ;;  %v2267_v52 = vld [vmem:[#allocation5 + $0x9a8] ss:$16 sps:$4 sm:$0xff]  }
 0x11c   :  { %v150_v55 = vpop.f32.mrb[2].mxu0  ;;  %v2268_v54 = vld [vmem:[#allocation5 + $0x9c0] ss:$16 sps:$4 sm:$0xff]  }
 0x11d   :  { %v153_v56 = vmax.f32 %v148_v53, 0.0  ;;  %v1951_v57 = vpop.f32.mrb[3].mxu0  ;;  %v2270_v53 = vld [vmem:[#allocation5 + $0x9c4] ss:$16 sps:$4 sm:$0xff]   ;;  %v2271_v55 = vld [vmem:[#allocation5 + $0x9c8] ss:$16 sps:$4 sm:$0xff]  }
 0x11e   :  { %v2272_v57 = vld [vmem:[#allocation5 + $0x9e0] ss:$16 sps:$4 sm:$0xff]  }
 0x11f   :  { %v188_v58 = vpack.c.bf16 %v153_v56, %v153_v56  ;;  %v2274_v56 = vld [vmem:[#allocation5 + $0x9e4] ss:$16 sps:$4 sm:$0xff]  }
 0x121   :  { %402 = vmatmul.mubr.bf16.vlgmr.msra.gmra.mrb[0].mxu1 %v188_v58  ;;  %443 = vmatmul.mubr.bf16.vlgmr.msra.gmra.mrb[4].mxu0 %v188_v58  ;;  %v2275_v58 = vld [vmem:[#allocation5 + $0x9e8] ss:$16 sps:$4 sm:$0xff]  }
 0x122   :  { %1968 = vmatprep.mubr.msk.bf16.mxu1 %vm2419_vm0, %v2418_v0  ;;  %757 = vmatprep.mubr.bf16.mxu0 %v2420_v45  ;;  %v2259_v45 = vld [vmem:[#allocation5 + $0x968] ss:$16 sps:$4 sm:$0xff]  }
 0x123   :  { %1953 = vmatpush3.bf16.msra.mxu1 %v2236_v59  ;;  %726 = vmatpush1.bf16.msra.mxu0 %v2244_v30  ;;  %v2569_v30 = vld [vmem:[#allocation5 + $0xa80] ss:$16 sps:$4 sm:$0xff]  }
 0x124   :  { %1954 = vmatprep.subr.bf16.mxu1 %v2418_v0  ;;  %727 = vmatprep.subr.bf16.mxu0 %v2250_v32 }
 0x127   :  { %1955 = vmatpush3.bf16.msra.mxu1 %v2237_v60 }
 0x128   :  { %1956 = vmatprep.subr.bf16.mxu1 %v2418_v0 }
 0x12b   :  { %1957 = vmatpush3.bf16.msra.mxu1 %v2238_v61 }
 0x12c   :  { %1958 = vmatprep.subr.bf16.mxu1 %v2418_v0 }
 0x12f   :  { %1959 = vmatpush3.bf16.msra.mxu1 %v2239_v62 }
 0x130   :  { %1960 = vmatprep.subr.bf16.mxu1 %v2418_v0 }
 0x133   :  { %1961 = vmatpush3.bf16.msra.mxu1 %v2240_v25  ;;  %v2291_v25 = vld [vmem:[#allocation5 + $0x3e0] ss:$16 sps:$4 sm:$0xff]  }
 0x134   :  { %1962 = vmatprep.subr.bf16.mxu1 %v2418_v0 }
 0x137   :  { %1963 = vmatpush3.bf16.msra.mxu1 %v2241_v27  ;;  %v2557_v27 = vld [vmem:[#allocation5 + $0xa20] ss:$16 sps:$4 sm:$0xff]  }
 0x138   :  { %1964 = vmatprep.subr.bf16.mxu1 %v2418_v0 }
 0x13b   :  { %1965 = vmatpush3.bf16.msra.mxu1 %v2242_v28  ;;  %v2561_v28 = vld [vmem:[#allocation5 + $0xa40] ss:$16 sps:$4 sm:$0xff]  }
 0x13c   :  { %1966 = vmatprep.subr.bf16.mxu1 %v2418_v0 }
 0x13f   :  { %1967 = vmatpush3.bf16.msra.mxu1 %v2243_v29  ;;  %v2565_v29 = vld [vmem:[#allocation5 + $0xa60] ss:$16 sps:$4 sm:$0xff]  }
 0x140   :  { %1972 = vmatprep.subr.bf16.mxu1 %v2418_v0 }
 0x1f4   :  { %v403_v10 = vpop.f32.mrb[0].mxu1  ;;  %v444_v11 = vpop.f32.mrb[4].mxu0 }
 0x1f5   :  { %v404_v12 = vadd.f32 %v403_v10, %v196_v7  ;;  %v2508_v13 = vadd.f32 %v444_v11, %v204_v8  ;;  %v2510_v14 = vpop.f32.mrb[1].mxu1  ;;  %v446_v15 = vpop.f32.mrb[5].mxu0  ;;  %v2277_v8 = vld [vmem:[#allocation5 + $0x220] ss:$16 sps:$4 sm:$0xff]  }
 0x1f6   :  { %v447_v16 = vadd.f32 %v446_v15, %v208_v9  ;;  %v407_v17 = vpop.f32.mrb[2].mxu1  ;;  %v448_v18 = vpop.f32.mrb[6].mxu0  ;;  %v2278_v9 = vld [vmem:[#allocation5 + $0x240] ss:$16 sps:$4 sm:$0xff]  }
 0x1f7   :  { %v822_v19 = vmul.f32 0.5, %v404_v12  ;;  %v408_v20 = vpop.f32.mrb[3].mxu1  ;;  %v449_v21 = vpop.f32.mrb[7].mxu0  ;;  %v2279_v10 = vld [vmem:[#allocation5 + $0x260] ss:$16 sps:$4 sm:$0xff]  }
 0x1f8   :  { %451 = vmax.xlane.f32.xlu0 %v447_v16  ;;  %v2280_v11 = vld [vmem:[#allocation5 + $0x280] ss:$16 sps:$4 sm:$0xff]  }
 0x1f9   :  { %2332 = vtanh.f32 %v822_v19  ;;  %v2281_v12 = vld [vmem:[#allocation5 + $0x2a0] ss:$16 sps:$4 sm:$0xff]  }
 0x1fa   :  { %v2282_v15 = vld [vmem:[#allocation5 + $0x2c0] ss:$16 sps:$4 sm:$0xff]  }
 0x1fb   :  { %v2284_v18 = vld [vmem:[#allocation5 + $0x300] ss:$16 sps:$4 sm:$0xff]  }
 0x1fc   :  { %v2285_v19 = vld [vmem:[#allocation5 + $0x320] ss:$16 sps:$4 sm:$0xff]  }
 0x1fd   :  { %v2286_v20 = vld [vmem:[#allocation5 + $0x340] ss:$16 sps:$4 sm:$0xff]  }
 0x1fe   :  { %v2287_v21 = vld [vmem:[#allocation5 + $0x360] ss:$16 sps:$4 sm:$0xff]  }
 0x203   :  { %v2333_v22 = vpop.eup %2332 }
 0x204   :  { %v824_v23 = vadd.f32 1.0, %v2333_v22  ;;  %v2288_v22 = vld [vmem:[#allocation5 + $0x380] ss:$16 sps:$4 sm:$0xff]  }
 0x206   :  { %v825_v24 = vmul.f32 0.5, %v824_v23  ;;  %v2289_v23 = vld [vmem:[#allocation5 + $0x3a0] ss:$16 sps:$4 sm:$0xff]  }
 0x208   :  { %v2513_v26 = vmul.f32 %v825_v24, %v2474_v5  ;;  %v2248_v5 = vld [vmem:[#allocation5 + $0x920] ss:$16 sps:$4 sm:$0xff]  }
 0x209   :  { %728 = vmatpush1.bf16.msra.mxu0 %v2248_v5  ;;  %v2290_v24 = vld [vmem:[#allocation5 + $0x3c0] ss:$16 sps:$4 sm:$0xff]  }
 0x20a   :  { %729 = vmatprep.subr.bf16.mxu0 %v2254_v33  ;;  %v844_v17 = vpack.c.bf16 %v2513_v26, %v2513_v26  ;;  %v2554_v26 = vld [vmem:[#allocation5 + $0xa00] ss:$16 sps:$4 sm:$0xff]  }
 0x20d   :  { %730 = vmatpush1.bf16.msra.mxu0 %v2252_v34 }
 0x20e   :  { %731 = vmatprep.subr.bf16.mxu0 %v2258_v35 }
 0x211   :  { %732 = vmatpush1.bf16.msra.mxu0 %v2256_v36 }
 0x212   :  { %733 = vmatprep.subr.bf16.mxu0 %v2262_v46 }
 0x215   :  { %734 = vmatpush1.bf16.msra.mxu0 %v2260_v48 }
 0x216   :  { %735 = vmatprep.subr.bf16.mxu0 %v2266_v51  ;;  %v2585_v51 = vld [vmem:[#allocation5 + $0xac0] ss:$16 sps:$4 sm:$0xff]  }
 0x219   :  { %736 = vmatpush1.bf16.msra.mxu0 %v2264_v50 }
 0x21a   :  { %737 = vmatprep.subr.bf16.mxu0 %v2270_v53  ;;  %v2300_v53 = vld [vmem:[#allocation5 + $0x400] ss:$16 sps:$4 sm:$0xff]  }
 0x21d   :  { %738 = vmatpush1.bf16.msra.mxu0 %v2268_v54  ;;  %v2301_v54 = vld [vmem:[#allocation5 + $0x420] ss:$16 sps:$4 sm:$0xff]  }
 0x21e   :  { %739 = vmatprep.subr.bf16.mxu0 %v2274_v56  ;;  %v2303_v56 = vld [vmem:[#allocation5 + $0x460] ss:$16 sps:$4 sm:$0xff]  }
 0x221   :  { %740 = vmatpush1.bf16.msra.mxu0 %v2272_v57  ;;  %v2304_v57 = vld [vmem:[#allocation5 + $0x480] ss:$16 sps:$4 sm:$0xff]  }
 0x222   :  { %1992 = vmatprep.subr.bf16.mxu0 %v2418_v0 }
 0x285   :  { %v452_v37 = vpop.xlane.xlu0 %451 }
 0x286   :  { %v453_v38 = vsub.f32 %v447_v16, %v452_v37  ;;  %v2283_v16 = vld [vmem:[#allocation5 + $0x2e0] ss:$16 sps:$4 sm:$0xff]  }
 0x288   :  { %v454_v39 = vmul.f32 1.442695, %v453_v38 }
 0x28a   :  { %2334 = vpow2.f32 %v454_v39  ;;  %v843_v39 = vld [vmem:[#allocation5 + $0xb00] sm:$0x2] }
 0x294   :  { %v2335_v40 = vpop.eup %2334 }
 0x295   :  { %v472_v42 = vpack.c.bf16 %v2335_v40, %v2335_v40 }
 0x297   :  { %1969 = vmatmul.mubr.bf16.vlgmr.msra.gmra.mrb[4].mxu1 %v472_v42 }
 0x298   :  { %1973 = vmatpush3.bf16.msra.mxu1 %v2247_v41  ;;  %1988 = vmatprep.mubr.msk.bf16.mxu1 %vm2419_vm0, %v2418_v0  ;;  %v848_v41 = vsub.s32 2, %v2490_v47 }
 0x299   :  { %1974 = vmatprep.subr.bf16.mxu1 %v2418_v0 }
 0x29c   :  { %1975 = vmatpush3.bf16.msra.mxu1 %v2251_v43 }
 0x29d   :  { %1976 = vmatprep.subr.bf16.mxu1 %v2418_v0 }
 0x2a0   :  { %1977 = vmatpush3.bf16.msra.mxu1 %v2255_v44 }
 0x2a1   :  { %1978 = vmatprep.subr.bf16.mxu1 %v2418_v0 }
 0x2a4   :  { %1979 = vmatpush3.bf16.msra.mxu1 %v2259_v45 }
 0x2a5   :  { %1980 = vmatprep.subr.bf16.mxu1 %v2418_v0 }
 0x2a8   :  { %1981 = vmatpush3.bf16.msra.mxu1 %v2263_v49 }
 0x2a9   :  { %1982 = vmatprep.subr.bf16.mxu1 %v2418_v0 }
 0x2ac   :  { %1983 = vmatpush3.bf16.msra.mxu1 %v2267_v52  ;;  %v2589_v52 = vld [vmem:[#allocation5 + $0xae0] ss:$16 sps:$4 sm:$0xff]  }
 0x2ad   :  { %1984 = vmatprep.subr.bf16.mxu1 %v2418_v0 }
 0x2b0   :  { %1985 = vmatpush3.bf16.msra.mxu1 %v2271_v55  ;;  %v2302_v55 = vld [vmem:[#allocation5 + $0x440] ss:$16 sps:$4 sm:$0xff]  }
 0x2b1   :  { %1986 = vmatprep.subr.bf16.mxu1 %v2418_v0 }
 0x2b4   :  { %1987 = vmatpush3.bf16.msra.mxu1 %v2275_v58  ;;  %v2305_v58 = vld [vmem:[#allocation5 + $0x4a0] ss:$16 sps:$4 sm:$0xff]  }
 0x2b5   :  { %2012 = vmatprep.subr.bf16.mxu1 %v2418_v0 }
 0x36a   :  { %v555_v59 = vpop.f32.mrb[4].mxu1 }
 0x36b   :  { %v561_v60 = vmax.f32 %v555_v59, 1e-30  ;;  %v1970_v61 = vpop.f32.mrb[5].mxu1  ;;  %v2306_v59 = vld [vmem:[#allocation5 + $0x4c0] ss:$16 sps:$4 sm:$0xff]  }
 0x36c   :  { %v558_v62 = vpop.f32.mrb[6].mxu1 }
 0x36d   :  { %2336 = vrcp.f32 %v561_v60  ;;  %v1971_v1 = vpop.f32.mrb[7].mxu1  ;;  %v958_v60 = vsub.s32 3, %v2490_v47 }
 0x377   :  { %v2337_v2 = vpop.eup %2336 }
 0x378   :  { %v563_v4 = vmul.f32 %v2337_v2, %v2335_v40  ;;  %v845_v40 = vunpack.c.l.bf16 %v843_v39  ;;  %v1164_v39 = vsub.s32 4, %v2490_v47 }
 0x37a   :  { %v596_v7 = vpack.c.bf16 %v563_v4, %v563_v4  ;;  %v849_v42 = vrot.slane %v845_v40, %v848_v41  ;;  %v959_v61 = vrot.slane %v845_v40, %v958_v60 }
 0x37c   :  { %758 = vmatmul.mubr.bf16.vlgmr.msra.gmra.mrb[8].mxu0 %v596_v7  ;;  %1989 = vmatmul.mubr.bf16.vlgmr.msra.gmra.mrb[8].mxu1 %v596_v7 }
 0x37d   :  { %1993 = vmatpush3.bf16.msra.mxu0 %v2276_v6  ;;  %2008 = vmatprep.mubr.msk.bf16.mxu0 %vm2419_vm0, %v2418_v0 }
 0x37e   :  { %1994 = vmatprep.subr.bf16.mxu0 %v2418_v0  ;;  %2028 = vmatprep.mubr.msk.bf16.mxu1 %vm2419_vm0, %v2418_v0 }
 0x37f   :  { %2013 = vmatpush3.bf16.msra.mxu1 %v2284_v18  ;;  %v190_v18 = vunpack.c.h.bf16 %v2499_v63  ;;  %v2314_v63 = vld [vmem:[#allocation5 + $0x5c0] ss:$16 sps:$4 sm:$0xff]  }
 0x380   :  { %2014 = vmatprep.subr.bf16.mxu1 %v2418_v0 }
 0x381   :  { %1995 = vmatpush3.bf16.msra.mxu0 %v2277_v8 }
 0x382   :  { %1996 = vmatprep.subr.bf16.mxu0 %v2418_v0 }
 0x383   :  { %2015 = vmatpush3.bf16.msra.mxu1 %v2285_v19  ;;  %v200_v19 = vrot.slane %v190_v18, %v2503_v3  ;;  %v2315_v3 = vld [vmem:[#allocation5 + $0x5e0] ss:$16 sps:$4 sm:$0xff]  }
 0x384   :  { %2016 = vmatprep.subr.bf16.mxu1 %v2418_v0 }
 0x385   :  { %1997 = vmatpush3.bf16.msra.mxu0 %v2278_v9  ;;  %v2307_v9 = vld [vmem:[#allocation5 + $0x4e0] ss:$16 sps:$4 sm:$0xff]  }
 0x386   :  { %1998 = vmatprep.subr.bf16.mxu0 %v2418_v0 }
 0x387   :  { %2017 = vmatpush3.bf16.msra.mxu1 %v2286_v20  ;;  %v406_v20 = vadd.f32 %v2510_v14, %v200_v19  ;;  %v1159_v14 = vld [vmem:[#allocation5 + $0xb00] sm:$0x4] }
 0x388   :  { %2018 = vmatprep.subr.bf16.mxu1 %v2418_v0 }
 0x389   :  { %1999 = vmatpush3.bf16.msra.mxu0 %v2279_v10  ;;  %v2308_v10 = vld [vmem:[#allocation5 + $0x500] ss:$16 sps:$4 sm:$0xff]  }
 0x38a   :  { %2000 = vmatprep.subr.bf16.mxu0 %v2418_v0 }
 0x38b   :  { %2019 = vmatpush3.bf16.msra.mxu1 %v2287_v21  ;;  %v1138_v21 = vmul.f32 0.5, %v406_v20 }
 0x38c   :  { %2020 = vmatprep.subr.bf16.mxu1 %v2418_v0 }
 0x38d   :  { %2001 = vmatpush3.bf16.msra.mxu0 %v2280_v11  ;;  %v2309_v11 = vld [vmem:[#allocation5 + $0x520] ss:$16 sps:$4 sm:$0xff]   ;;  %2338 = vtanh.f32 %v1138_v21 }
 0x38e   :  { %2002 = vmatprep.subr.bf16.mxu0 %v2418_v0 }
 0x38f   :  { %2021 = vmatpush3.bf16.msra.mxu1 %v2288_v22 }
 0x390   :  { %2022 = vmatprep.subr.bf16.mxu1 %v2418_v0 }
 0x391   :  { %2003 = vmatpush3.bf16.msra.mxu0 %v2281_v12  ;;  %v2310_v12 = vld [vmem:[#allocation5 + $0x540] ss:$16 sps:$4 sm:$0xff]  }
 0x392   :  { %2004 = vmatprep.subr.bf16.mxu0 %v2418_v0 }
 0x393   :  { %2023 = vmatpush3.bf16.msra.mxu1 %v2289_v23 }
 0x394   :  { %2024 = vmatprep.subr.bf16.mxu1 %v2418_v0 }
 0x395   :  { %2005 = vmatpush3.bf16.msra.mxu0 %v2282_v15  ;;  %v2311_v15 = vld [vmem:[#allocation5 + $0x560] ss:$16 sps:$4 sm:$0xff]  }
 0x396   :  { %2006 = vmatprep.subr.bf16.mxu0 %v2418_v0 }
 0x397   :  { %2025 = vmatpush3.bf16.msra.mxu1 %v2290_v24  ;;  %v2339_v22 = vpop.eup %2338 }
 0x398   :  { %2026 = vmatprep.subr.bf16.mxu1 %v2418_v0  ;;  %v1140_v23 = vadd.f32 1.0, %v2339_v22 }
 0x399   :  { %2007 = vmatpush3.bf16.msra.mxu0 %v2283_v16  ;;  %v2312_v16 = vld [vmem:[#allocation5 + $0x580] ss:$16 sps:$4 sm:$0xff]  }
 0x39a   :  { %2032 = vmatprep.subr.bf16.mxu0 %v2418_v0  ;;  %v1141_v24 = vmul.f32 0.5, %v1140_v23 }
 0x39b   :  { %2027 = vmatpush3.bf16.msra.mxu1 %v2291_v25 }
 0x39c   :  { %2009 = vmatmul.mubr.bf16.vlgmr.msra.gmra.mrb[12].mxu0 %v844_v17  ;;  %2052 = vmatprep.subr.bf16.mxu1 %v2418_v0  ;;  %v2313_v17 = vld [vmem:[#allocation5 + $0x5a0] ss:$16 sps:$4 sm:$0xff]  }
 0x39d   :  { %2048 = vmatprep.mubr.msk.bf16.mxu0 %vm2419_vm0, %v2418_v0  ;;  %2033 = vmatpush3.bf16.msra.mxu0 %v2554_v26 }
 0x39e   :  { %2034 = vmatprep.subr.bf16.mxu0 %v2418_v0 }
 0x3a1   :  { %2035 = vmatpush3.bf16.msra.mxu0 %v2557_v27 }
 0x3a2   :  { %2036 = vmatprep.subr.bf16.mxu0 %v2418_v0 }
 0x3a5   :  { %2037 = vmatpush3.bf16.msra.mxu0 %v2561_v28 }
 0x3a6   :  { %2038 = vmatprep.subr.bf16.mxu0 %v2418_v0 }
 0x3a9   :  { %2039 = vmatpush3.bf16.msra.mxu0 %v2565_v29 }
 0x3aa   :  { %2040 = vmatprep.subr.bf16.mxu0 %v2418_v0 }
 0x3ad   :  { %2041 = vmatpush3.bf16.msra.mxu0 %v2569_v30 }
 0x3ae   :  { %2042 = vmatprep.subr.bf16.mxu0 %v2418_v0 }
 0x3b1   :  { %2043 = vmatpush3.bf16.msra.mxu0 %v2573_v31 }
 0x3b2   :  { %2044 = vmatprep.subr.bf16.mxu0 %v2418_v0 }
 0x3b5   :  { %2045 = vmatpush3.bf16.msra.mxu0 %v2585_v51 }
 0x3b6   :  { %2046 = vmatprep.subr.bf16.mxu0 %v2418_v0 }
 0x3b9   :  { %2047 = vmatpush3.bf16.msra.mxu0 %v2589_v52 }
 0x3ba   :  { %2072 = vmatprep.subr.bf16.mxu0 %v2418_v0 }
 0x44f   :  { %v759_v32 = vpop.f32.mrb[8].mxu0  ;;  %v2578_v5 = vpop.f32.mrb[8].mxu1 }
 0x450   :  { %v2580_v33 = vpop.f32.mrb[9].mxu0  ;;  %v1990_v34 = vpop.f32.mrb[9].mxu1 }
 0x451   :  { %v763_v35 = vpop.f32.mrb[10].mxu0  ;;  %v803_v36 = vpop.f32.mrb[10].mxu1 }
 0x452   :  { %v764_v37 = vpop.f32.mrb[11].mxu0  ;;  %v1991_v38 = vpop.f32.mrb[11].mxu1 }
 0x453   :  { %v1161_v38 = vunpack.c.l.bf16 %v1159_v14 }
 0x455   :  { %v1165_v40 = vrot.slane %v1161_v38, %v1164_v39 }
 0x46f   :  { %v932_v43 = vpop.f32.mrb[12].mxu0 }
 0x470   :  { %v933_v44 = vadd.f32 %v932_v43, %v849_v42  ;;  %v2010_v45 = vpop.f32.mrb[13].mxu0 }
 0x471   :  { %v935_v46 = vpop.f32.mrb[14].mxu0 }
 0x472   :  { %v938_v48 = vmax.f32 %v933_v44, 0.0  ;;  %v2011_v49 = vpop.f32.mrb[15].mxu0 }
 0x473   :  { %v2316_v49 = vld [vmem:[#allocation5 + $0x600] ss:$16 sps:$4 sm:$0xff]  }
 0x474   :  { %v955_v50 = vpack.c.bf16 %v938_v48, %v938_v48 }
 0x476   :  { %2029 = vmatmul.mubr.bf16.vlgmr.msra.gmra.mrb[12].mxu1 %v955_v50  ;;  %v2317_v50 = vld [vmem:[#allocation5 + $0x620] ss:$16 sps:$4 sm:$0xff]  }
 0x477   :  { %2068 = vmatprep.mubr.msk.bf16.mxu1 %vm2419_vm0, %v2418_v0  ;;  %2053 = vmatpush3.bf16.msra.mxu1 %v2300_v53  ;;  %v2318_v53 = vld [vmem:[#allocation5 + $0x640] ss:$16 sps:$4 sm:$0xff]  }
 0x478   :  { %2054 = vmatprep.subr.bf16.mxu1 %v2418_v0 }
 0x47b   :  { %2055 = vmatpush3.bf16.msra.mxu1 %v2301_v54  ;;  %v2319_v54 = vld [vmem:[#allocation5 + $0x660] ss:$16 sps:$4 sm:$0xff]  }
 0x47c   :  { %2056 = vmatprep.subr.bf16.mxu1 %v2418_v0 }
 0x47f   :  { %2057 = vmatpush3.bf16.msra.mxu1 %v2302_v55  ;;  %v2320_v55 = vld [vmem:[#allocation5 + $0x680] ss:$16 sps:$4 sm:$0xff]  }
 0x480   :  { %2058 = vmatprep.subr.bf16.mxu1 %v2418_v0 }
 0x483   :  { %2059 = vmatpush3.bf16.msra.mxu1 %v2303_v56  ;;  %v2321_v56 = vld [vmem:[#allocation5 + $0x6a0] ss:$16 sps:$4 sm:$0xff]  }
 0x484   :  { %2060 = vmatprep.subr.bf16.mxu1 %v2418_v0 }
 0x487   :  { %2061 = vmatpush3.bf16.msra.mxu1 %v2304_v57  ;;  %v1274_v57 = vsub.s32 5, %v2490_v47 }
 0x488   :  { %2062 = vmatprep.subr.bf16.mxu1 %v2418_v0 }
 0x48b   :  { %2063 = vmatpush3.bf16.msra.mxu1 %v2305_v58  ;;  %v1275_v58 = vrot.slane %v1161_v38, %v1274_v57 }
 0x48c   :  { %2064 = vmatprep.subr.bf16.mxu1 %v2418_v0 }
 0x48f   :  { %2065 = vmatpush3.bf16.msra.mxu1 %v2306_v59 }
 0x490   :  { %2066 = vmatprep.subr.bf16.mxu1 %v2418_v0 }
 0x493   :  { %2067 = vmatpush3.bf16.msra.mxu1 %v2307_v9  ;;  %v2325_v9 = vld [vmem:[#allocation5 + $0x720] ss:$16 sps:$4 sm:$0xff]  }
 0x494   :  { %2092 = vmatprep.subr.bf16.mxu1 %v2418_v0 }
 0x549   :  { %v1042_v62 = vpop.f32.mrb[12].mxu1 }
 0x54a   :  { %v1043_v1 = vadd.f32 %v1042_v62, %v959_v61  ;;  %v2030_v2 = vpop.f32.mrb[13].mxu1 }
 0x54b   :  { %v1045_v4 = vpop.f32.mrb[14].mxu1 }
 0x54c   :  { %v1048_v6 = vmul.f32 %v1043_v1, %v759_v32  ;;  %v2031_v7 = vpop.f32.mrb[15].mxu1 }
 0x54d   :  { %v2323_v7 = vld [vmem:[#allocation5 + $0x6e0] ss:$16 sps:$4 sm:$0xff]  }
 0x54e   :  { %v1049_v8 = vpack.c.bf16 %v1048_v6, %v1048_v6  ;;  %v2322_v6 = vld [vmem:[#allocation5 + $0x6c0] ss:$16 sps:$4 sm:$0xff]  }
 0x550   :  { %2049 = vmatmul.mubr.bf16.vlgmr.msra.gmra.mrb[16].mxu0 %v1049_v8  ;;  %v2324_v8 = vld [vmem:[#allocation5 + $0x700] ss:$16 sps:$4 sm:$0xff]  }
 0x551   :  { %2088 = vmatprep.mubr.msk.bf16.mxu0 %vm2419_vm0, %v2418_v0  ;;  %2073 = vmatpush3.bf16.msra.mxu0 %v2308_v10  ;;  %v2327_v10 = vld [vmem:[#allocation5 + $0x760] ss:$16 sps:$4 sm:$0xff]  }
 0x552   :  { %2074 = vmatprep.subr.bf16.mxu0 %v2418_v0 }
 0x555   :  { %2075 = vmatpush3.bf16.msra.mxu0 %v2309_v11  ;;  %v2328_v11 = vld [vmem:[#allocation5 + $0x780] ss:$16 sps:$4 sm:$0xff]  }
 0x556   :  { %2076 = vmatprep.subr.bf16.mxu0 %v2418_v0 }
 0x559   :  { %2077 = vmatpush3.bf16.msra.mxu0 %v2310_v12  ;;  %v2329_v12 = vld [vmem:[#allocation5 + $0x7a0] ss:$16 sps:$4 sm:$0xff]  }
 0x55a   :  { %2078 = vmatprep.subr.bf16.mxu0 %v2418_v0 }
 0x55d   :  { %2079 = vmatpush3.bf16.msra.mxu0 %v2311_v15  ;;  %v1407_v15 = vmul.f32 0.5, %v2508_v13  ;;  %v2330_v13 = vld [vmem:[#allocation5 + $0x7c0] ss:$16 sps:$4 sm:$0xff]  }
 0x55e   :  { %2080 = vmatprep.subr.bf16.mxu0 %v2418_v0 }
 0x55f   :  { %2340 = vtanh.f32 %v1407_v15 }
 0x561   :  { %2081 = vmatpush3.bf16.msra.mxu0 %v2312_v16 }
 0x562   :  { %2082 = vmatprep.subr.bf16.mxu0 %v2418_v0 }
 0x565   :  { %2083 = vmatpush3.bf16.msra.mxu0 %v2313_v17 }
 0x566   :  { %2084 = vmatprep.subr.bf16.mxu0 %v2418_v0 }
 0x569   :  { %2085 = vmatpush3.bf16.msra.mxu0 %v2314_v63  ;;  %v2341_v16 = vpop.eup %2340 }
 0x56a   :  { %2086 = vmatprep.subr.bf16.mxu0 %v2418_v0  ;;  %v1409_v17 = vadd.f32 1.0, %v2341_v16 }
 0x56c   :  { %v1410_v20 = vmul.f32 0.5, %v1409_v17 }
 0x56d   :  { %2087 = vmatpush3.bf16.msra.mxu0 %v2315_v3 }
 0x56e   :  { %2112 = vmatprep.subr.bf16.mxu0 %v2418_v0 }
 0x623   :  { %v2613_v25 = vpop.f32.mrb[16].mxu0 }
 0x624   :  { %v1142_v32 = vmul.f32 %v1141_v24, %v2613_v25  ;;  %v2050_v34 = vpop.f32.mrb[17].mxu0 }
 0x625   :  { %v1135_v35 = vpop.f32.mrb[18].mxu0 }
 0x626   :  { %v1160_v36 = vpack.c.bf16 %v1142_v32, %v1142_v32  ;;  %v2051_v37 = vpop.f32.mrb[19].mxu0 }
 0x628   :  { %2069 = vmatmul.mubr.bf16.vlgmr.msra.gmra.mrb[16].mxu1 %v1160_v36 }
 0x629   :  { %2093 = vmatpush3.bf16.msra.mxu1 %v2554_v26  ;;  %2108 = vmatprep.mubr.msk.bf16.mxu1 %vm2419_vm0, %v2418_v0 }
 0x62a   :  { %2094 = vmatprep.subr.bf16.mxu1 %v2418_v0 }
 0x62d   :  { %2095 = vmatpush3.bf16.msra.mxu1 %v2557_v27 }
 0x62e   :  { %2096 = vmatprep.subr.bf16.mxu1 %v2418_v0 }
 0x631   :  { %2097 = vmatpush3.bf16.msra.mxu1 %v2561_v28 }
 0x632   :  { %2098 = vmatprep.subr.bf16.mxu1 %v2418_v0 }
 0x635   :  { %2099 = vmatpush3.bf16.msra.mxu1 %v2565_v29 }
 0x636   :  { %2100 = vmatprep.subr.bf16.mxu1 %v2418_v0 }
 0x639   :  { %2101 = vmatpush3.bf16.msra.mxu1 %v2569_v30 }
 0x63a   :  { %2102 = vmatprep.subr.bf16.mxu1 %v2418_v0 }
 0x63d   :  { %2103 = vmatpush3.bf16.msra.mxu1 %v2573_v31 }
 0x63e   :  { %2104 = vmatprep.subr.bf16.mxu1 %v2418_v0 }
 0x641   :  { %2105 = vmatpush3.bf16.msra.mxu1 %v2585_v51 }
 0x642   :  { %2106 = vmatprep.subr.bf16.mxu1 %v2418_v0 }
 0x645   :  { %2107 = vmatpush3.bf16.msra.mxu1 %v2589_v52 }
 0x646   :  { %2132 = vmatprep.subr.bf16.mxu1 %v2418_v0 }
 0x6fb   :  { %v1248_v41 = vpop.f32.mrb[16].mxu1 }
 0x6fc   :  { %v1249_v42 = vadd.f32 %v1248_v41, %v1165_v40  ;;  %v2070_v43 = vpop.f32.mrb[17].mxu1 }
 0x6fd   :  { %v1251_v44 = vpop.f32.mrb[18].mxu1 }
 0x6fe   :  { %v1254_v45 = vmax.f32 %v1249_v42, 0.0  ;;  %v2071_v46 = vpop.f32.mrb[19].mxu1 }
 0x700   :  { %v1271_v48 = vpack.c.bf16 %v1254_v45, %v1254_v45 }
 0x702   :  { %2089 = vmatmul.mubr.bf16.vlgmr.msra.gmra.mrb[20].mxu0 %v1271_v48 }
 0x703   :  { %2128 = vmatprep.mubr.msk.bf16.mxu0 %vm2419_vm0, %v2418_v0  ;;  %2113 = vmatpush3.bf16.msra.mxu0 %v2316_v49 }
 0x704   :  { %2114 = vmatprep.subr.bf16.mxu0 %v2418_v0 }
 0x707   :  { %2115 = vmatpush3.bf16.msra.mxu0 %v2317_v50 }
 0x708   :  { %2116 = vmatprep.subr.bf16.mxu0 %v2418_v0 }
 0x70b   :  { %2117 = vmatpush3.bf16.msra.mxu0 %v2318_v53 }
 0x70c   :  { %2118 = vmatprep.subr.bf16.mxu0 %v2418_v0 }
 0x70f   :  { %2119 = vmatpush3.bf16.msra.mxu0 %v2319_v54 }
 0x710   :  { %2120 = vmatprep.subr.bf16.mxu0 %v2418_v0 }
 0x713   :  { %2121 = vmatpush3.bf16.msra.mxu0 %v2320_v55 }
 0x714   :  { %2122 = vmatprep.subr.bf16.mxu0 %v2418_v0 }
 0x717   :  { %2123 = vmatpush3.bf16.msra.mxu0 %v2321_v56 }
 0x718   :  { %2124 = vmatprep.subr.bf16.mxu0 %v2418_v0 }
 0x71b   :  { %2125 = vmatpush3.bf16.msra.mxu0 %v2322_v6 }
 0x71c   :  { %2126 = vmatprep.subr.bf16.mxu0 %v2418_v0 }
 0x71f   :  { %2127 = vmatpush3.bf16.msra.mxu0 %v2323_v7 }
 0x720   :  { %2152 = vmatprep.subr.bf16.mxu0 %v2418_v0 }
 0x7d5   :  { %v1358_v59 = vpop.f32.mrb[20].mxu0 }
 0x7d6   :  { %v1359_v60 = vadd.f32 %v1358_v59, %v1275_v58  ;;  %v2090_v61 = vpop.f32.mrb[21].mxu0 }
 0x7d7   :  { %v1361_v62 = vpop.f32.mrb[22].mxu0 }
 0x7d8   :  { %v1364_v1 = vmul.f32 %v1359_v60, %v2580_v33  ;;  %v2091_v2 = vpop.f32.mrb[23].mxu0  ;;  %v2326_v33 = vld [vmem:[#allocation5 + $0x740] ss:$16 sps:$4 sm:$0xff]  }
 0x7da   :  { %v1365_v4 = vpack.c.bf16 %v1364_v1, %v1364_v1 }
 0x7dc   :  { %2109 = vmatmul.mubr.bf16.vlgmr.msra.gmra.mrb[20].mxu1 %v1365_v4 }
 0x7dd   :  { %2148 = vmatprep.mubr.msk.bf16.mxu1 %vm2419_vm0, %v2418_v0  ;;  %2133 = vmatpush3.bf16.msra.mxu1 %v2324_v8 }
 0x7de   :  { %2134 = vmatprep.subr.bf16.mxu1 %v2418_v0 }
 0x7e1   :  { %2135 = vmatpush3.bf16.msra.mxu1 %v2325_v9 }
 0x7e2   :  { %2136 = vmatprep.subr.bf16.mxu1 %v2418_v0 }
 0x7e5   :  { %2137 = vmatpush3.bf16.msra.mxu1 %v2326_v33 }
 0x7e6   :  { %2138 = vmatprep.subr.bf16.mxu1 %v2418_v0 }
 0x7e9   :  { %2139 = vmatpush3.bf16.msra.mxu1 %v2327_v10 }
 0x7ea   :  { %2140 = vmatprep.subr.bf16.mxu1 %v2418_v0 }
 0x7ed   :  { %2141 = vmatpush3.bf16.msra.mxu1 %v2328_v11 }
 0x7ee   :  { %2142 = vmatprep.subr.bf16.mxu1 %v2418_v0 }
 0x7f1   :  { %2143 = vmatpush3.bf16.msra.mxu1 %v2329_v12 }
 0x7f2   :  { %2144 = vmatprep.subr.bf16.mxu1 %v2418_v0 }
 0x7f5   :  { %2145 = vmatpush3.bf16.msra.mxu1 %v2330_v13 }
 0x7f6   :  { %2146 = vmatprep.subr.bf16.mxu1 %v2418_v0 }
 0x8af   :  { %v1400_v18 = vpop.f32.mrb[20].mxu1 }
 0x8b0   :  { %v1406_v19 = vadd.f32 %v1400_v18, %v2613_v25  ;;  %v2110_v21 = vpop.f32.mrb[21].mxu1 }
 0x8b1   :  { %v1403_v22 = vpop.f32.mrb[22].mxu1 }
 0x8b2   :  { %v1411_v23 = vmul.f32 %v1410_v20, %v1406_v19  ;;  %v2111_v24 = vpop.f32.mrb[23].mxu1 }
 0x8b4   :  { %v1429_v32 = vpack.c.bf16 %v1411_v23, %v1411_v23 }
 0x8b6   :  { %2129 = vmatmul.mubr.bf16.vlgmr.msra.gmra.mrb[24].mxu0 %v1429_v32 }
 0x8b7   :  { %2153 = vmatpush3.bf16.msra.mxu0 %v2554_v26  ;;  %2168 = vmatprep.mubr.msk.bf16.mxu0 %vm2419_vm0, %v2418_v0  ;;  %v2331_v26 = vld [vmem:[#allocation5 + $0x7e0] ss:$16 sps:$4 sm:$0xff]  }
 0x8b8   :  { %2154 = vmatprep.subr.bf16.mxu0 %v2418_v0  ;;  %2147 = vmatpush3.bf16.msra.mxu1 %v2331_v26 }
 0x8bb   :  { %2155 = vmatpush3.bf16.msra.mxu0 %v2557_v27  ;;  %v1428_v27 = vld [vmem:[#allocation5 + $0xb00] sm:$0x8] }
 0x8bc   :  { %2156 = vmatprep.subr.bf16.mxu0 %v2418_v0 }
 0x8bf   :  { %2157 = vmatpush3.bf16.msra.mxu0 %v2561_v28  ;;  %v1430_v28 = vunpack.c.l.bf16 %v1428_v27 }
 0x8c0   :  { %2158 = vmatprep.subr.bf16.mxu0 %v2418_v0 }
 0x8c3   :  { %2159 = vmatpush3.bf16.msra.mxu0 %v2565_v29  ;;  %v1433_v29 = vsub.s32 6, %v2490_v47 }
 0x8c4   :  { %2160 = vmatprep.subr.bf16.mxu0 %v2418_v0 }
 0x8c7   :  { %2161 = vmatpush3.bf16.msra.mxu0 %v2569_v30  ;;  %v1434_v30 = vrot.slane %v1430_v28, %v1433_v29 }
 0x8c8   :  { %2162 = vmatprep.subr.bf16.mxu0 %v2418_v0 }
 0x8cb   :  { %2163 = vmatpush3.bf16.msra.mxu0 %v2573_v31 }
 0x8cc   :  { %2164 = vmatprep.subr.bf16.mxu0 %v2418_v0 }
 0x8cf   :  { %2165 = vmatpush3.bf16.msra.mxu0 %v2585_v51 }
 0x8d0   :  { %2166 = vmatprep.subr.bf16.mxu0 %v2418_v0 }
 0x8d3   :  { %2167 = vmatpush3.bf16.msra.mxu0 %v2589_v52  ;;  %v1543_v52 = vsub.s32 7, %v2490_v47 }
 0x8d5   :  { %v1544_v63 = vrot.slane %v1430_v28, %v1543_v52 }
 0x989   :  { %v1517_v31 = vpop.f32.mrb[24].mxu0 }
 0x98a   :  { %v1518_v25 = vadd.f32 %v1517_v31, %v1434_v30  ;;  %v2130_v34 = vpop.f32.mrb[25].mxu0 }
 0x98b   :  { %v1520_v35 = vpop.f32.mrb[26].mxu0 }
 0x98c   :  { %v1523_v51 = vmax.f32 %v1518_v25, 0.0  ;;  %v2131_v36 = vpop.f32.mrb[27].mxu0 }
 0x98e   :  { %v1540_v37 = vpack.c.bf16 %v1523_v51, %v1523_v51 }
 0x990   :  { %2149 = vmatmul.mubr.bf16.vlgmr.msra.gmra.mrb[24].mxu1 %v1540_v37 }
 0xa63   :  { %v1627_v3 = vpop.f32.mrb[24].mxu1 }
 0xa64   :  { %v1628_v0 = vadd.f32 %v1627_v3, %v1544_v63  ;;  %v2150_v14 = vpop.f32.mrb[25].mxu1 }
 0xa65   :  { %v1630_v38 = vpop.f32.mrb[26].mxu1 }
 0xa66   :  { %v1633_v39 = vmul.f32 %v1628_v0, %v2578_v5  ;;  %v2151_v40 = vpop.f32.mrb[27].mxu1 }
 0xa68   :  { %v1634_v41 = vpack.c.bf16 %v1633_v39, %v1633_v39 }
 0xa6a   :  { %2169 = vmatmul.mubr.bf16.vlgmr.msra.gmra.mrb[28].mxu0 %v1634_v41 }
 0xb3d   :  { %v1669_v42 = vpop.f32.mrb[28].mxu0 }
 0xb3e   :  { %v1675_v43 = vadd.f32 %v1669_v42, %v1406_v19  ;;  %v2170_v44 = vpop.f32.mrb[29].mxu0 }
 0xb3f   :  { %v1672_v45 = vpop.f32.mrb[30].mxu0 }
 0xb40   :  { %1676 = vst [vmem:[#allocation7] sm:$0xff] %v1675_v43  ;;  %v2171_v46 = vpop.f32.mrb[31].mxu0 }
 0xb41   :  { %2397 = shalt.err (!%p2394_p6)
}
 0xb42   :  { %s2398_s10 = scalar_lea.hbm %s2694_s2, 128 }
 0xb43   :  { %p2399_p7 = scmp.ne.s32.totalorder %s2694_s2, %s2398_s10  ;;  %p2402_p8 = scmp.lt.u32.totalorder %s2398_s10, %s2694_s2 }
 0xb45   :  { %p2404_p9 = pnand %p2402_p8, %p2399_p7 }
 0xb47   :  { %2407 = shalt.err (!%p2404_p9)
}
 0xb48   :  { %1686 = dma.vmem_to_hbm [thread:$0]  %s1684_s6, 128, %s2694_s2, [#allocation4]  }
 0xb49   :  { %2412 = dma.done.wait [#allocation4], 128  }
 0xb4a   :  { %2413 = vsyncadd [#allocation4], 4294967168 }
 0xb4b   :  { %1690 = vsyncpa [#allocation3], 1 }
 0xb4c   :  { %1691 = vsyncpa [#allocation6], 1 }
 0xb4d   :  { %1692 = vsyncpa [#allocation4], 1 }

</bundles_post_ra>
